<compile_context>
chip_gen: v7x
topology: tpu7x:2x2x1
jax: 0.10.0
libtpu: 0.0.40
codegen_flags: <defaults>
</compile_context>

<pallas_src>
import functools
import math

import numpy as np
import jax
import jax.numpy as jnp
from jax import lax
from jax.experimental import pallas as pl
from jax.experimental.pallas import tpu as pltpu

_K = 7   # conv kernel size
_PD = 3  # 'same' padding


# --------------------------- host-side table building -------------------------
def _build_tables(w_flat, C, H, W, x_dtype):
    """Precompute per-gate band / lane-shift / mean-selection matrices."""
    w = w_flat.reshape(3, 2, _K, _K).astype(jnp.float32)   # (gate, ch, kh, kw)

    def band_pair(gate, P, swap):
        # Band_j[p, ch*P + p'] = w[gate, ch, i, j] with sublane tap i = p'-p+3
        # (i and j swapped for the transposed-layout hc gate).
        r = jnp.arange(P)[:, None]
        c = jnp.arange(P)[None, :]
        tap = c - r + _PD
        valid = (tap >= 0) & (tap < _K)
        tap_c = jnp.clip(tap, 0, _K - 1)
        mats = []
        for j in range(_K):                    # lane-tap index
            blocks = []
            for ch in range(2):                # ch0 = max pool, ch1 = mean pool
                wv = w[gate, ch, j, :] if swap else w[gate, ch, :, j]   # (7,)
                blocks.append(jnp.where(valid, wv[tap_c], 0.0))
            mats.append(jnp.concatenate(blocks, axis=1))                # (P, 2P)
        return jnp.stack(mats, axis=0)                                  # (7, P, 2P)

    bands_cw = band_pair(0, C, swap=False)     # gate plane (C, W)
    bands_hc = band_pair(1, C, swap=True)      # gate plane (C, H), transposed layout
    bands_hw = band_pair(2, H, swap=False)     # gate plane (H, W)

    def rshift(Q):
        # RShift_j[q', q] = 1 iff q' == q + j - 3 (zero 'same' lane padding).
        r = jnp.arange(Q)[:, None]
        c = jnp.arange(Q)[None, :]
        return jnp.stack(
            [(r - c == (j - _PD)).astype(jnp.float32) for j in range(_K)], axis=0)

    rshift_w = rshift(W)                       # (7, W, W)
    rshift_h = rshift(H)                       # (7, H, H)

    # Mean pools as matmuls: x (C, HW) @ S -> (C, W) / (C, H); 1/H, 1/W folded.
    hw_idx = jnp.arange(H * W)
    s_mean_w = ((hw_idx[:, None] % W) == jnp.arange(W)[None, :]).astype(x_dtype) * (1.0 / H)
    s_mean_h = ((hw_idx[:, None] // W) == jnp.arange(H)[None, :]).astype(x_dtype) * (1.0 / W)

    return bands_cw, bands_hc, bands_hw, rshift_w, rshift_h, s_mean_w, s_mean_h


# ----------------------------------- kernel ----------------------------------
def _gate(pmax, pmean, bands_ref, rshift_ref, bias):
    """sigmoid(7x7 'same' conv(2->1, BN folded) + bias) * 1/3 — all on the MXU."""
    P, Q = pmax.shape
    pair = jnp.concatenate([pmax, pmean], axis=0)            # (2P, Q) f32
    acc0 = jnp.zeros((P, Q), jnp.float32)                    # two partial accumulators
    acc1 = jnp.zeros((P, Q), jnp.float32)                    # break the 7-deep add chain
    for j in range(_K):
        m = jnp.dot(bands_ref[j], pair, preferred_element_type=jnp.float32)   # (P, Q)
        t = jnp.dot(m, rshift_ref[j], preferred_element_type=jnp.float32)     # (P, Q)
        if j % 2 == 0:
            acc0 = acc0 + t
        else:
            acc1 = acc1 + t
    return jax.nn.sigmoid(acc0 + acc1 + bias) * (1.0 / 3.0)


def _triplet_kernel(x_ref, bcw_ref, bhc_ref, bhw_ref, rw_ref, rh_ref,
                    smw_ref, smh_ref, bias_ref, o_ref, *, C, H, W, bb, out_group):
    f32 = jnp.float32

    def do_one(b):
        xm = x_ref[b]                                         # (C, H*W), pool-phase load

        # ---- mean pools on the MXU (scales folded into the selection mats) ----
        pmean_cw = jnp.dot(xm, smw_ref[...], preferred_element_type=f32)   # (C, W)
        pmean_hc = jnp.dot(xm, smh_ref[...], preferred_element_type=f32)   # (C, H)

        # ---- channel (C) pools for the hw branch: one slab-wide reduce each ----
        cmax = jnp.max(xm, axis=0, keepdims=True).astype(f32)              # (1, H*W)
        # For f32 inputs the astype below is a no-op (no extra slab copy).
        csum = jnp.sum(xm.astype(f32), axis=0, keepdims=True)              # (1, H*W)
        pmax_hw = jnp.concatenate(
            [cmax[:, h * W:(h + 1) * W] for h in range(H)], axis=0)        # (H, W)
        pmean_hw = jnp.concatenate(
            [csum[:, h * W:(h + 1) * W] for h in range(H)], axis=0) * (1.0 / C)

        # ---- max pools over H (cw) and over W (hc): two partial max chains ----
        m0 = m1 = None
        hc_cols = []
        for h in range(H):
            xs = xm[:, h * W:(h + 1) * W]                                   # (C, W)
            if h % 2 == 0:
                m0 = xs if m0 is None else jnp.maximum(m0, xs)
            else:
                m1 = xs if m1 is None else jnp.maximum(m1, xs)
            hc_cols.append(jnp.max(xs, axis=1, keepdims=True))              # (C, 1)
        pmax_cw = (m0 if m1 is None else jnp.maximum(m0, m1)).astype(f32)   # (C, W)
        pmax_hc = jnp.concatenate(hc_cols, axis=1).astype(f32)              # (C, H)

        # ---- the three attention gates (1/3 folded in) ----
        s_cw = _gate(pmax_cw, pmean_cw, bcw_ref, rw_ref, bias_ref[0])       # (C, W)
        s_hc = _gate(pmax_hc, pmean_hc, bhc_ref, rh_ref, bias_ref[1])       # (C, H)
        s_hw = _gate(pmax_hw, pmean_hw, bhw_ref, rw_ref, bias_ref[2])       # (H, W)

        # ---- combine & store, chunked so each store is lane-dense ----
        # (gate cast to the input dtype => bf16 combine on bf16 inputs; f32 here)
        for h0 in range(0, H, out_group):
            pieces = []
            for dh in range(out_group):
                h = h0 + dh
                s = s_cw + s_hc[:, h:h + 1] + s_hw[h:h + 1, :]              # (C, W)
                xs = x_ref[b, :, h * W:(h + 1) * W]                         # re-read chunk
                pieces.append((xs * s.astype(xs.dtype)).astype(o_ref.dtype))
            chunk = pieces[0] if out_group == 1 else jnp.concatenate(pieces, axis=1)
            o_ref[b, :, h0 * W:(h0 + out_group) * W] = chunk

    if bb <= 2:
        for b in range(bb):                                   # short static unroll
            do_one(b)
    else:
        def body(b, carry):                                   # caps code size / live ranges
            do_one(b)
            return carry
        lax.fori_loop(0, bb, body, 0)


# ---------------------------------- wrapper ----------------------------------
def _vmem_capacity_bytes():
    try:
        return int(pltpu.get_tpu_info().vmem_capacity_bytes)
    except Exception:
        return 128 << 20


def triplet_attention_pallas(x, w_flat, b_all, *, block_batch=None):
    B, C, H, W = x.shape
    HW = H * W
    dt = x.dtype
    x2 = x.reshape(B, C, HW)                                  # free (contiguous) reshape

    (bands_cw, bands_hc, bands_hw,
     rshift_w, rshift_h, s_mean_w, s_mean_h) = _build_tables(w_flat, C, H, W, dt)

    # ---- per-generation block / VMEM policy ----
    phys_vmem = _vmem_capacity_bytes()
    if phys_vmem <= (64 << 20):          # v7x-class: 64 MiB physical VMEM
        block_target = 3 << 20
        vmem_cap = 56 << 20              # leave headroom for compiler scratch
    else:                                 # v5e / v6e: 128 MiB physical VMEM
        block_target = 6 << 20
        vmem_cap = 100 << 20

    slab_bytes = C * HW * dt.itemsize
    if block_batch is None:
        cap = max(1, block_target // max(slab_bytes, 1))
        cap = min(cap, B, 8)
        divs = [d for d in range(1, B + 1) if B % d == 0 and d <= cap]

        def rank(d):
            steps = B // d
            # prefer an even number of grid steps >= 2 (v7x two-core sharding),
            # then >= 2 steps, then the largest block.
            return ((steps % 2 == 0 and steps >= 2), steps >= 2, d)

        bb = max(divs, key=rank) if divs else 1
    else:
        bb = block_batch
        assert B % bb == 0

    # Store chunking: group h-rows so each stored chunk spans a multiple of 128
    # lanes when possible (keeps unmasked vst).
    out_group = max(1, min(H, 128 // math.gcd(W, 128)))
    while H % out_group:
        out_group -= 1

    aux_bytes = sum(int(np.prod(a.shape)) * a.dtype.itemsize
                    for a in (bands_cw, bands_hc, bands_hw,
                              rshift_w, rshift_h, s_mean_w, s_mean_h))
    vmem_need = (2 * 2 * bb * slab_bytes      # double-buffered in + out blocks
                 + 2 * aux_bytes              # constant tables (conservatively x2)
                 + 2 * C * HW * 4             # live pool-phase values
                 + (2 << 20))                 # headroom
    vmem_limit = int(min(max(vmem_need, 32 << 20), vmem_cap))

    kernel = functools.partial(_triplet_kernel, C=C, H=H, W=W, bb=bb,
                               out_group=out_group)
    c3 = lambda i: (0, 0, 0)
    c2 = lambda i: (0, 0)
    out2 = pl.pallas_call(
        kernel,
        out_shape=jax.ShapeDtypeStruct((B, C, HW), dt),
        grid=(B // bb,),
        in_specs=[
            pl.BlockSpec((bb, C, HW), lambda i: (i, 0, 0)),          # x slab block
            pl.BlockSpec((_K, C, 2 * C), c3),                        # cw bands
            pl.BlockSpec((_K, C, 2 * C), c3),                        # hc bands
            pl.BlockSpec((_K, H, 2 * H), c3),                        # hw bands
            pl.BlockSpec((_K, W, W), c3),                            # lane shifts (Q=W)
            pl.BlockSpec((_K, H, H), c3),                            # lane shifts (Q=H)
            pl.BlockSpec((HW, W), c2),                               # mean-over-H selector
            pl.BlockSpec((HW, H), c2),                               # mean-over-W selector
            pl.BlockSpec(memory_space=pltpu.MemorySpace.SMEM),       # folded BN biases (3,)
        ],
        out_specs=pl.BlockSpec((bb, C, HW), lambda i: (i, 0, 0)),
        compiler_params=pltpu.CompilerParams(
            dimension_semantics=("parallel",),
            vmem_limit_bytes=vmem_limit,
        ),
    )(x2, bands_cw, bands_hc, bands_hw, rshift_w, rshift_h, s_mean_w, s_mean_h, b_all)
    return out2.reshape(B, C, H, W)


# ----------------------------- pure-JAX reference -----------------------------
def _attention_gate_ref(xp, w, gamma, beta, mean, var, eps=1e-5):
    pooled = jnp.stack([jnp.max(xp, axis=1), jnp.mean(xp, axis=1)], axis=1)  # (B,2,P,Q)
    y = jax.lax.conv_general_dilated(
        pooled, w, window_strides=(1, 1), padding=[(3, 3), (3, 3)],
        dimension_numbers=("NCHW", "OIHW", "NCHW"),
        precision=jax.lax.Precision.HIGHEST)
    y = (y - mean) / jnp.sqrt(var + eps) * gamma + beta
    return xp * jax.nn.sigmoid(y)


def triplet_attention_ref(x, w_raw, gamma, beta, mean, var):
    xp1 = jnp.transpose(x, (0, 2, 1, 3))
    o11 = jnp.transpose(
        _attention_gate_ref(xp1, w_raw[0], gamma[0, 0], beta[0, 0], mean[0, 0], var[0, 0]),
        (0, 2, 1, 3))
    xp2 = jnp.transpose(x, (0, 3, 2, 1))
    o21 = jnp.transpose(
        _attention_gate_ref(xp2, w_raw[1], gamma[1, 0], beta[1, 0], mean[1, 0], var[1, 0]),
        (0, 3, 2, 1))
    o3 = _attention_gate_ref(x, w_raw[2], gamma[2, 0], beta[2, 0], mean[2, 0], var[2, 0])
    return (1.0 / 3.0) * (o3 + o11 + o21)


if __name__ == "__main__":
    B, C, H, W = 2, 8, 16, 16
    key = jax.random.PRNGKey(0)
    k_x, k_w, k_g, k_b, k_m, k_v, k_x2 = jax.random.split(key, 7)

    x = jax.random.normal(k_x, (B, C, H, W), jnp.float32)

    # Parameters of the 3 AttentionGates (order: cw, hc, hw), deterministic init.
    w_raw = 0.1 * jax.random.normal(k_w, (3, 1, 2, 7, 7), jnp.float32)   # Conv2d(2,1,7) weights
    gamma = 1.0 + 0.1 * jax.random.normal(k_g, (3, 1), jnp.float32)      # BN weight
    beta = 0.1 * jax.random.normal(k_b, (3, 1), jnp.float32)             # BN bias
    run_mean = 0.1 * jax.random.normal(k_m, (3, 1), jnp.float32)         # BN running_mean
    run_var = 1.0 + 0.1 * jax.random.uniform(k_v, (3, 1), jnp.float32)   # BN running_var
    eps = 1e-5

    # Fold inference-mode BN into the (bias-free) conv.
    inv_std = 1.0 / jnp.sqrt(run_var + eps)                               # (3, 1)
    eff_w = w_raw * (gamma * inv_std)[:, :, None, None, None]             # (3,1,2,7,7)
    eff_b = (beta - gamma * run_mean * inv_std).reshape(3)                # (3,)
    w_flat = eff_w.reshape(-1)                                            # (294,)

    out = jax.block_until_ready(triplet_attention_pallas(x, w_flat, eff_b))
    ref = triplet_attention_ref(x, w_raw, gamma, beta, run_mean, run_var)
    # Tolerance covers the MXU contraction precision of the small gate matmuls.
    np.testing.assert_allclose(np.asarray(out), np.asarray(ref), rtol=2e-3, atol=2e-3)

    # Also exercise the bb > 2 (in-kernel fori_loop) batch path on tiny maps.
    x8 = jax.random.normal(k_x2, (8, 8, 8, 8), jnp.float32)
    out8 = jax.block_until_ready(triplet_attention_pallas(x8, w_flat, eff_b, block_batch=4))
    ref8 = triplet_attention_ref(x8, w_raw, gamma, beta, run_mean, run_var)
    np.testing.assert_allclose(np.asarray(out8), np.asarray(ref8), rtol=2e-3, atol=2e-3)

    print("KERNEL_OK")
</pallas_src>

<mosaic_0001>
module attributes {stable_mosaic.version = 11 : i64} {
  func.func @_triplet_kernel(%arg0: i32, %arg1: memref<1x8x256xf32, #tpu.memory_space<vmem>>, %arg2: memref<7x8x16xf32, #tpu.memory_space<vmem>>, %arg3: memref<7x8x16xf32, #tpu.memory_space<vmem>>, %arg4: memref<7x16x32xf32, #tpu.memory_space<vmem>>, %arg5: memref<7x16x16xf32, #tpu.memory_space<vmem>>, %arg6: memref<7x16x16xf32, #tpu.memory_space<vmem>>, %arg7: memref<256x16xf32, #tpu.memory_space<vmem>>, %arg8: memref<256x16xf32, #tpu.memory_space<vmem>>, %arg9: memref<3xf32, #tpu.memory_space<smem>>, %arg10: memref<1x8x256xf32, #tpu.memory_space<vmem>>) attributes {dimension_semantics = [#tpu.dimension_semantics<parallel>], iteration_bounds = array<i64: 2>, scalar_prefetch = 0 : i64, scratch_operands = 0 : i64, tpu.core_type = #tpu.core_type<tc>, window_params = [{transform_indices = @transform_0, window_bounds = array<i64: 1, 8, 256>}, {pipeline_mode = #tpu.pipeline_mode<synchronous>, transform_indices = @transform_1, window_bounds = array<i64: 7, 8, 16>}, {pipeline_mode = #tpu.pipeline_mode<synchronous>, transform_indices = @transform_2, window_bounds = array<i64: 7, 8, 16>}, {pipeline_mode = #tpu.pipeline_mode<synchronous>, transform_indices = @transform_3, window_bounds = array<i64: 7, 16, 32>}, {pipeline_mode = #tpu.pipeline_mode<synchronous>, transform_indices = @transform_4, window_bounds = array<i64: 7, 16, 16>}, {pipeline_mode = #tpu.pipeline_mode<synchronous>, transform_indices = @transform_5, window_bounds = array<i64: 7, 16, 16>}, {pipeline_mode = #tpu.pipeline_mode<synchronous>, transform_indices = @transform_6, window_bounds = array<i64: 256, 16>}, {pipeline_mode = #tpu.pipeline_mode<synchronous>, transform_indices = @transform_7, window_bounds = array<i64: 256, 16>}, {transform_indices = @transform_8, window_bounds = array<i64: 3>}, {transform_indices = @transform_9, window_bounds = array<i64: 1, 8, 256>}]} {
    %c0 = arith.constant 0 : index
    %c0_0 = arith.constant 0 : index
    %c0_1 = arith.constant 0 : index
    %0 = vector.load %arg1[%c0, %c0_0, %c0_1] : memref<1x8x256xf32, #tpu.memory_space<vmem>>, vector<1x8x256xf32>
    %1 = vector.shape_cast %0 : vector<1x8x256xf32> to vector<8x256xf32>
    %c0_2 = arith.constant 0 : index
    %c0_3 = arith.constant 0 : index
    %2 = vector.load %arg7[%c0_2, %c0_3] : memref<256x16xf32, #tpu.memory_space<vmem>>, vector<256x16xf32>
    %cst = arith.constant dense<0.000000e+00> : vector<8x16xf32>
    %3 = tpu.matmul %1, %2, %cst {dimension_numbers = #tpu.dot_dimension_numbers<[1], [0], [0], [1], [0, 0, 1, 1], [], []>} : vector<8x256xf32>, vector<256x16xf32>, vector<8x16xf32> -> vector<8x16xf32>
    %c0_4 = arith.constant 0 : index
    %c0_5 = arith.constant 0 : index
    %4 = vector.load %arg8[%c0_4, %c0_5] : memref<256x16xf32, #tpu.memory_space<vmem>>, vector<256x16xf32>
    %cst_6 = arith.constant dense<0.000000e+00> : vector<8x16xf32>
    %5 = tpu.matmul %1, %4, %cst_6 {dimension_numbers = #tpu.dot_dimension_numbers<[1], [0], [0], [1], [0, 0, 1, 1], [], []>} : vector<8x256xf32>, vector<256x16xf32>, vector<8x16xf32> -> vector<8x16xf32>
    %cst_7 = arith.constant dense<0xFF800000> : vector<256xf32>
    %6 = vector.multi_reduction <maximumf>, %1, %cst_7 [0] : vector<8x256xf32> to vector<256xf32>
    %7 = vector.shape_cast %6 : vector<256xf32> to vector<1x256xf32>
    %cst_8 = arith.constant dense<0.000000e+00> : vector<256xf32>
    %8 = vector.multi_reduction <add>, %1, %cst_8 [0] : vector<8x256xf32> to vector<256xf32>
    %9 = vector.shape_cast %8 : vector<256xf32> to vector<1x256xf32>
    %10 = vector.extract_strided_slice %7 {offsets = [0, 0], sizes = [1, 16], strides = [1, 1]} : vector<1x256xf32> to vector<1x16xf32>
    %11 = vector.extract_strided_slice %7 {offsets = [0, 16], sizes = [1, 16], strides = [1, 1]} : vector<1x256xf32> to vector<1x16xf32>
    %12 = vector.extract_strided_slice %7 {offsets = [0, 32], sizes = [1, 16], strides = [1, 1]} : vector<1x256xf32> to vector<1x16xf32>
    %13 = vector.extract_strided_slice %7 {offsets = [0, 48], sizes = [1, 16], strides = [1, 1]} : vector<1x256xf32> to vector<1x16xf32>
    %14 = vector.extract_strided_slice %7 {offsets = [0, 64], sizes = [1, 16], strides = [1, 1]} : vector<1x256xf32> to vector<1x16xf32>
    %15 = vector.extract_strided_slice %7 {offsets = [0, 80], sizes = [1, 16], strides = [1, 1]} : vector<1x256xf32> to vector<1x16xf32>
    %16 = vector.extract_strided_slice %7 {offsets = [0, 96], sizes = [1, 16], strides = [1, 1]} : vector<1x256xf32> to vector<1x16xf32>
    %17 = vector.extract_strided_slice %7 {offsets = [0, 112], sizes = [1, 16], strides = [1, 1]} : vector<1x256xf32> to vector<1x16xf32>
    %18 = vector.extract_strided_slice %7 {offsets = [0, 128], sizes = [1, 16], strides = [1, 1]} : vector<1x256xf32> to vector<1x16xf32>
    %19 = vector.extract_strided_slice %7 {offsets = [0, 144], sizes = [1, 16], strides = [1, 1]} : vector<1x256xf32> to vector<1x16xf32>
    %20 = vector.extract_strided_slice %7 {offsets = [0, 160], sizes = [1, 16], strides = [1, 1]} : vector<1x256xf32> to vector<1x16xf32>
    %21 = vector.extract_strided_slice %7 {offsets = [0, 176], sizes = [1, 16], strides = [1, 1]} : vector<1x256xf32> to vector<1x16xf32>
    %22 = vector.extract_strided_slice %7 {offsets = [0, 192], sizes = [1, 16], strides = [1, 1]} : vector<1x256xf32> to vector<1x16xf32>
    %23 = vector.extract_strided_slice %7 {offsets = [0, 208], sizes = [1, 16], strides = [1, 1]} : vector<1x256xf32> to vector<1x16xf32>
    %24 = vector.extract_strided_slice %7 {offsets = [0, 224], sizes = [1, 16], strides = [1, 1]} : vector<1x256xf32> to vector<1x16xf32>
    %25 = vector.extract_strided_slice %7 {offsets = [0, 240], sizes = [1, 16], strides = [1, 1]} : vector<1x256xf32> to vector<1x16xf32>
    %26 = tpu.concatenate %10, %11, %12, %13, %14, %15, %16, %17, %18, %19, %20, %21, %22, %23, %24, %25 in 0 : vector<1x16xf32>, vector<1x16xf32>, vector<1x16xf32>, vector<1x16xf32>, vector<1x16xf32>, vector<1x16xf32>, vector<1x16xf32>, vector<1x16xf32>, vector<1x16xf32>, vector<1x16xf32>, vector<1x16xf32>, vector<1x16xf32>, vector<1x16xf32>, vector<1x16xf32>, vector<1x16xf32>, vector<1x16xf32> -> vector<16x16xf32>
    %27 = vector.extract_strided_slice %9 {offsets = [0, 0], sizes = [1, 16], strides = [1, 1]} : vector<1x256xf32> to vector<1x16xf32>
    %28 = vector.extract_strided_slice %9 {offsets = [0, 16], sizes = [1, 16], strides = [1, 1]} : vector<1x256xf32> to vector<1x16xf32>
    %29 = vector.extract_strided_slice %9 {offsets = [0, 32], sizes = [1, 16], strides = [1, 1]} : vector<1x256xf32> to vector<1x16xf32>
    %30 = vector.extract_strided_slice %9 {offsets = [0, 48], sizes = [1, 16], strides = [1, 1]} : vector<1x256xf32> to vector<1x16xf32>
    %31 = vector.extract_strided_slice %9 {offsets = [0, 64], sizes = [1, 16], strides = [1, 1]} : vector<1x256xf32> to vector<1x16xf32>
    %32 = vector.extract_strided_slice %9 {offsets = [0, 80], sizes = [1, 16], strides = [1, 1]} : vector<1x256xf32> to vector<1x16xf32>
    %33 = vector.extract_strided_slice %9 {offsets = [0, 96], sizes = [1, 16], strides = [1, 1]} : vector<1x256xf32> to vector<1x16xf32>
    %34 = vector.extract_strided_slice %9 {offsets = [0, 112], sizes = [1, 16], strides = [1, 1]} : vector<1x256xf32> to vector<1x16xf32>
    %35 = vector.extract_strided_slice %9 {offsets = [0, 128], sizes = [1, 16], strides = [1, 1]} : vector<1x256xf32> to vector<1x16xf32>
    %36 = vector.extract_strided_slice %9 {offsets = [0, 144], sizes = [1, 16], strides = [1, 1]} : vector<1x256xf32> to vector<1x16xf32>
    %37 = vector.extract_strided_slice %9 {offsets = [0, 160], sizes = [1, 16], strides = [1, 1]} : vector<1x256xf32> to vector<1x16xf32>
    %38 = vector.extract_strided_slice %9 {offsets = [0, 176], sizes = [1, 16], strides = [1, 1]} : vector<1x256xf32> to vector<1x16xf32>
    %39 = vector.extract_strided_slice %9 {offsets = [0, 192], sizes = [1, 16], strides = [1, 1]} : vector<1x256xf32> to vector<1x16xf32>
    %40 = vector.extract_strided_slice %9 {offsets = [0, 208], sizes = [1, 16], strides = [1, 1]} : vector<1x256xf32> to vector<1x16xf32>
    %41 = vector.extract_strided_slice %9 {offsets = [0, 224], sizes = [1, 16], strides = [1, 1]} : vector<1x256xf32> to vector<1x16xf32>
    %42 = vector.extract_strided_slice %9 {offsets = [0, 240], sizes = [1, 16], strides = [1, 1]} : vector<1x256xf32> to vector<1x16xf32>
    %43 = tpu.concatenate %27, %28, %29, %30, %31, %32, %33, %34, %35, %36, %37, %38, %39, %40, %41, %42 in 0 : vector<1x16xf32>, vector<1x16xf32>, vector<1x16xf32>, vector<1x16xf32>, vector<1x16xf32>, vector<1x16xf32>, vector<1x16xf32>, vector<1x16xf32>, vector<1x16xf32>, vector<1x16xf32>, vector<1x16xf32>, vector<1x16xf32>, vector<1x16xf32>, vector<1x16xf32>, vector<1x16xf32>, vector<1x16xf32> -> vector<16x16xf32>
    %cst_9 = arith.constant 1.250000e-01 : f32
    %44 = vector.broadcast %cst_9 : f32 to vector<16x16xf32>
    %45 = arith.mulf %43, %44 : vector<16x16xf32>
    %46 = vector.extract_strided_slice %1 {offsets = [0, 0], sizes = [8, 16], strides = [1, 1]} : vector<8x256xf32> to vector<8x16xf32>
    %cst_10 = arith.constant dense<0xFF800000> : vector<8xf32>
    %47 = vector.multi_reduction <maximumf>, %46, %cst_10 [1] : vector<8x16xf32> to vector<8xf32>
    %48 = vector.shape_cast %47 : vector<8xf32> to vector<8x1xf32>
    %49 = vector.extract_strided_slice %1 {offsets = [0, 16], sizes = [8, 16], strides = [1, 1]} : vector<8x256xf32> to vector<8x16xf32>
    %cst_11 = arith.constant dense<0xFF800000> : vector<8xf32>
    %50 = vector.multi_reduction <maximumf>, %49, %cst_11 [1] : vector<8x16xf32> to vector<8xf32>
    %51 = vector.shape_cast %50 : vector<8xf32> to vector<8x1xf32>
    %52 = vector.extract_strided_slice %1 {offsets = [0, 32], sizes = [8, 16], strides = [1, 1]} : vector<8x256xf32> to vector<8x16xf32>
    %53 = arith.maximumf %46, %52 : vector<8x16xf32>
    %cst_12 = arith.constant dense<0xFF800000> : vector<8xf32>
    %54 = vector.multi_reduction <maximumf>, %52, %cst_12 [1] : vector<8x16xf32> to vector<8xf32>
    %55 = vector.shape_cast %54 : vector<8xf32> to vector<8x1xf32>
    %56 = vector.extract_strided_slice %1 {offsets = [0, 48], sizes = [8, 16], strides = [1, 1]} : vector<8x256xf32> to vector<8x16xf32>
    %57 = arith.maximumf %49, %56 : vector<8x16xf32>
    %cst_13 = arith.constant dense<0xFF800000> : vector<8xf32>
    %58 = vector.multi_reduction <maximumf>, %56, %cst_13 [1] : vector<8x16xf32> to vector<8xf32>
    %59 = vector.shape_cast %58 : vector<8xf32> to vector<8x1xf32>
    %60 = vector.extract_strided_slice %1 {offsets = [0, 64], sizes = [8, 16], strides = [1, 1]} : vector<8x256xf32> to vector<8x16xf32>
    %61 = arith.maximumf %53, %60 : vector<8x16xf32>
    %cst_14 = arith.constant dense<0xFF800000> : vector<8xf32>
    %62 = vector.multi_reduction <maximumf>, %60, %cst_14 [1] : vector<8x16xf32> to vector<8xf32>
    %63 = vector.shape_cast %62 : vector<8xf32> to vector<8x1xf32>
    %64 = vector.extract_strided_slice %1 {offsets = [0, 80], sizes = [8, 16], strides = [1, 1]} : vector<8x256xf32> to vector<8x16xf32>
    %65 = arith.maximumf %57, %64 : vector<8x16xf32>
    %cst_15 = arith.constant dense<0xFF800000> : vector<8xf32>
    %66 = vector.multi_reduction <maximumf>, %64, %cst_15 [1] : vector<8x16xf32> to vector<8xf32>
    %67 = vector.shape_cast %66 : vector<8xf32> to vector<8x1xf32>
    %68 = vector.extract_strided_slice %1 {offsets = [0, 96], sizes = [8, 16], strides = [1, 1]} : vector<8x256xf32> to vector<8x16xf32>
    %69 = arith.maximumf %61, %68 : vector<8x16xf32>
    %cst_16 = arith.constant dense<0xFF800000> : vector<8xf32>
    %70 = vector.multi_reduction <maximumf>, %68, %cst_16 [1] : vector<8x16xf32> to vector<8xf32>
    %71 = vector.shape_cast %70 : vector<8xf32> to vector<8x1xf32>
    %72 = vector.extract_strided_slice %1 {offsets = [0, 112], sizes = [8, 16], strides = [1, 1]} : vector<8x256xf32> to vector<8x16xf32>
    %73 = arith.maximumf %65, %72 : vector<8x16xf32>
    %cst_17 = arith.constant dense<0xFF800000> : vector<8xf32>
    %74 = vector.multi_reduction <maximumf>, %72, %cst_17 [1] : vector<8x16xf32> to vector<8xf32>
    %75 = vector.shape_cast %74 : vector<8xf32> to vector<8x1xf32>
    %76 = vector.extract_strided_slice %1 {offsets = [0, 128], sizes = [8, 16], strides = [1, 1]} : vector<8x256xf32> to vector<8x16xf32>
    %77 = arith.maximumf %69, %76 : vector<8x16xf32>
    %cst_18 = arith.constant dense<0xFF800000> : vector<8xf32>
    %78 = vector.multi_reduction <maximumf>, %76, %cst_18 [1] : vector<8x16xf32> to vector<8xf32>
    %79 = vector.shape_cast %78 : vector<8xf32> to vector<8x1xf32>
    %80 = vector.extract_strided_slice %1 {offsets = [0, 144], sizes = [8, 16], strides = [1, 1]} : vector<8x256xf32> to vector<8x16xf32>
    %81 = arith.maximumf %73, %80 : vector<8x16xf32>
    %cst_19 = arith.constant dense<0xFF800000> : vector<8xf32>
    %82 = vector.multi_reduction <maximumf>, %80, %cst_19 [1] : vector<8x16xf32> to vector<8xf32>
    %83 = vector.shape_cast %82 : vector<8xf32> to vector<8x1xf32>
    %84 = vector.extract_strided_slice %1 {offsets = [0, 160], sizes = [8, 16], strides = [1, 1]} : vector<8x256xf32> to vector<8x16xf32>
    %85 = arith.maximumf %77, %84 : vector<8x16xf32>
    %cst_20 = arith.constant dense<0xFF800000> : vector<8xf32>
    %86 = vector.multi_reduction <maximumf>, %84, %cst_20 [1] : vector<8x16xf32> to vector<8xf32>
    %87 = vector.shape_cast %86 : vector<8xf32> to vector<8x1xf32>
    %88 = vector.extract_strided_slice %1 {offsets = [0, 176], sizes = [8, 16], strides = [1, 1]} : vector<8x256xf32> to vector<8x16xf32>
    %89 = arith.maximumf %81, %88 : vector<8x16xf32>
    %cst_21 = arith.constant dense<0xFF800000> : vector<8xf32>
    %90 = vector.multi_reduction <maximumf>, %88, %cst_21 [1] : vector<8x16xf32> to vector<8xf32>
    %91 = vector.shape_cast %90 : vector<8xf32> to vector<8x1xf32>
    %92 = vector.extract_strided_slice %1 {offsets = [0, 192], sizes = [8, 16], strides = [1, 1]} : vector<8x256xf32> to vector<8x16xf32>
    %93 = arith.maximumf %85, %92 : vector<8x16xf32>
    %cst_22 = arith.constant dense<0xFF800000> : vector<8xf32>
    %94 = vector.multi_reduction <maximumf>, %92, %cst_22 [1] : vector<8x16xf32> to vector<8xf32>
    %95 = vector.shape_cast %94 : vector<8xf32> to vector<8x1xf32>
    %96 = vector.extract_strided_slice %1 {offsets = [0, 208], sizes = [8, 16], strides = [1, 1]} : vector<8x256xf32> to vector<8x16xf32>
    %97 = arith.maximumf %89, %96 : vector<8x16xf32>
    %cst_23 = arith.constant dense<0xFF800000> : vector<8xf32>
    %98 = vector.multi_reduction <maximumf>, %96, %cst_23 [1] : vector<8x16xf32> to vector<8xf32>
    %99 = vector.shape_cast %98 : vector<8xf32> to vector<8x1xf32>
    %100 = vector.extract_strided_slice %1 {offsets = [0, 224], sizes = [8, 16], strides = [1, 1]} : vector<8x256xf32> to vector<8x16xf32>
    %101 = arith.maximumf %93, %100 : vector<8x16xf32>
    %cst_24 = arith.constant dense<0xFF800000> : vector<8xf32>
    %102 = vector.multi_reduction <maximumf>, %100, %cst_24 [1] : vector<8x16xf32> to vector<8xf32>
    %103 = vector.shape_cast %102 : vector<8xf32> to vector<8x1xf32>
    %104 = vector.extract_strided_slice %1 {offsets = [0, 240], sizes = [8, 16], strides = [1, 1]} : vector<8x256xf32> to vector<8x16xf32>
    %105 = arith.maximumf %97, %104 : vector<8x16xf32>
    %cst_25 = arith.constant dense<0xFF800000> : vector<8xf32>
    %106 = vector.multi_reduction <maximumf>, %104, %cst_25 [1] : vector<8x16xf32> to vector<8xf32>
    %107 = vector.shape_cast %106 : vector<8xf32> to vector<8x1xf32>
    %108 = arith.maximumf %101, %105 : vector<8x16xf32>
    %109 = tpu.concatenate %48, %51, %55, %59, %63, %67, %71, %75, %79, %83, %87, %91, %95, %99, %103, %107 in 1 : vector<8x1xf32>, vector<8x1xf32>, vector<8x1xf32>, vector<8x1xf32>, vector<8x1xf32>, vector<8x1xf32>, vector<8x1xf32>, vector<8x1xf32>, vector<8x1xf32>, vector<8x1xf32>, vector<8x1xf32>, vector<8x1xf32>, vector<8x1xf32>, vector<8x1xf32>, vector<8x1xf32>, vector<8x1xf32> -> vector<8x16xf32>
    %c0_26 = arith.constant 0 : index
    %110 = memref.load %arg9[%c0_26] : memref<3xf32, #tpu.memory_space<smem>>
    %111 = tpu.concatenate %108, %3 in 0 : vector<8x16xf32>, vector<8x16xf32> -> vector<16x16xf32>
    %cst_27 = arith.constant 0.000000e+00 : f32
    %112 = vector.broadcast %cst_27 : f32 to vector<8x16xf32>
    %cst_28 = arith.constant 0.000000e+00 : f32
    %113 = vector.broadcast %cst_28 : f32 to vector<8x16xf32>
    %c0_29 = arith.constant 0 : index
    %c0_30 = arith.constant 0 : index
    %c0_31 = arith.constant 0 : index
    %114 = vector.load %arg2[%c0_29, %c0_30, %c0_31] : memref<7x8x16xf32, #tpu.memory_space<vmem>>, vector<1x8x16xf32>
    %115 = vector.shape_cast %114 : vector<1x8x16xf32> to vector<8x16xf32>
    %cst_32 = arith.constant dense<0.000000e+00> : vector<8x16xf32>
    %116 = tpu.matmul %115, %111, %cst_32 {dimension_numbers = #tpu.dot_dimension_numbers<[1], [0], [0], [1], [0, 0, 1, 1], [], []>} : vector<8x16xf32>, vector<16x16xf32>, vector<8x16xf32> -> vector<8x16xf32>
    %c0_33 = arith.constant 0 : index
    %c0_34 = arith.constant 0 : index
    %c0_35 = arith.constant 0 : index
    %117 = vector.load %arg5[%c0_33, %c0_34, %c0_35] : memref<7x16x16xf32, #tpu.memory_space<vmem>>, vector<1x16x16xf32>
    %118 = vector.shape_cast %117 : vector<1x16x16xf32> to vector<16x16xf32>
    %cst_36 = arith.constant dense<0.000000e+00> : vector<8x16xf32>
    %119 = tpu.matmul %116, %118, %cst_36 {dimension_numbers = #tpu.dot_dimension_numbers<[1], [0], [0], [1], [0, 0, 1, 1], [], []>} : vector<8x16xf32>, vector<16x16xf32>, vector<8x16xf32> -> vector<8x16xf32>
    %120 = arith.addf %112, %119 : vector<8x16xf32>
    %c1 = arith.constant 1 : index
    %c0_37 = arith.constant 0 : index
    %c0_38 = arith.constant 0 : index
    %121 = vector.load %arg2[%c1, %c0_37, %c0_38] : memref<7x8x16xf32, #tpu.memory_space<vmem>>, vector<1x8x16xf32>
    %122 = vector.shape_cast %121 : vector<1x8x16xf32> to vector<8x16xf32>
    %cst_39 = arith.constant dense<0.000000e+00> : vector<8x16xf32>
    %123 = tpu.matmul %122, %111, %cst_39 {dimension_numbers = #tpu.dot_dimension_numbers<[1], [0], [0], [1], [0, 0, 1, 1], [], []>} : vector<8x16xf32>, vector<16x16xf32>, vector<8x16xf32> -> vector<8x16xf32>
    %c1_40 = arith.constant 1 : index
    %c0_41 = arith.constant 0 : index
    %c0_42 = arith.constant 0 : index
    %124 = vector.load %arg5[%c1_40, %c0_41, %c0_42] : memref<7x16x16xf32, #tpu.memory_space<vmem>>, vector<1x16x16xf32>
    %125 = vector.shape_cast %124 : vector<1x16x16xf32> to vector<16x16xf32>
    %cst_43 = arith.constant dense<0.000000e+00> : vector<8x16xf32>
    %126 = tpu.matmul %123, %125, %cst_43 {dimension_numbers = #tpu.dot_dimension_numbers<[1], [0], [0], [1], [0, 0, 1, 1], [], []>} : vector<8x16xf32>, vector<16x16xf32>, vector<8x16xf32> -> vector<8x16xf32>
    %127 = arith.addf %113, %126 : vector<8x16xf32>
    %c2 = arith.constant 2 : index
    %c0_44 = arith.constant 0 : index
    %c0_45 = arith.constant 0 : index
    %128 = vector.load %arg2[%c2, %c0_44, %c0_45] : memref<7x8x16xf32, #tpu.memory_space<vmem>>, vector<1x8x16xf32>
    %129 = vector.shape_cast %128 : vector<1x8x16xf32> to vector<8x16xf32>
    %cst_46 = arith.constant dense<0.000000e+00> : vector<8x16xf32>
    %130 = tpu.matmul %129, %111, %cst_46 {dimension_numbers = #tpu.dot_dimension_numbers<[1], [0], [0], [1], [0, 0, 1, 1], [], []>} : vector<8x16xf32>, vector<16x16xf32>, vector<8x16xf32> -> vector<8x16xf32>
    %c2_47 = arith.constant 2 : index
    %c0_48 = arith.constant 0 : index
    %c0_49 = arith.constant 0 : index
    %131 = vector.load %arg5[%c2_47, %c0_48, %c0_49] : memref<7x16x16xf32, #tpu.memory_space<vmem>>, vector<1x16x16xf32>
    %132 = vector.shape_cast %131 : vector<1x16x16xf32> to vector<16x16xf32>
    %cst_50 = arith.constant dense<0.000000e+00> : vector<8x16xf32>
    %133 = tpu.matmul %130, %132, %cst_50 {dimension_numbers = #tpu.dot_dimension_numbers<[1], [0], [0], [1], [0, 0, 1, 1], [], []>} : vector<8x16xf32>, vector<16x16xf32>, vector<8x16xf32> -> vector<8x16xf32>
    %134 = arith.addf %120, %133 : vector<8x16xf32>
    %c3 = arith.constant 3 : index
    %c0_51 = arith.constant 0 : index
    %c0_52 = arith.constant 0 : index
    %135 = vector.load %arg2[%c3, %c0_51, %c0_52] : memref<7x8x16xf32, #tpu.memory_space<vmem>>, vector<1x8x16xf32>
    %136 = vector.shape_cast %135 : vector<1x8x16xf32> to vector<8x16xf32>
    %cst_53 = arith.constant dense<0.000000e+00> : vector<8x16xf32>
    %137 = tpu.matmul %136, %111, %cst_53 {dimension_numbers = #tpu.dot_dimension_numbers<[1], [0], [0], [1], [0, 0, 1, 1], [], []>} : vector<8x16xf32>, vector<16x16xf32>, vector<8x16xf32> -> vector<8x16xf32>
    %c3_54 = arith.constant 3 : index
    %c0_55 = arith.constant 0 : index
    %c0_56 = arith.constant 0 : index
    %138 = vector.load %arg5[%c3_54, %c0_55, %c0_56] : memref<7x16x16xf32, #tpu.memory_space<vmem>>, vector<1x16x16xf32>
    %139 = vector.shape_cast %138 : vector<1x16x16xf32> to vector<16x16xf32>
    %cst_57 = arith.constant dense<0.000000e+00> : vector<8x16xf32>
    %140 = tpu.matmul %137, %139, %cst_57 {dimension_numbers = #tpu.dot_dimension_numbers<[1], [0], [0], [1], [0, 0, 1, 1], [], []>} : vector<8x16xf32>, vector<16x16xf32>, vector<8x16xf32> -> vector<8x16xf32>
    %141 = arith.addf %127, %140 : vector<8x16xf32>
    %c4 = arith.constant 4 : index
    %c0_58 = arith.constant 0 : index
    %c0_59 = arith.constant 0 : index
    %142 = vector.load %arg2[%c4, %c0_58, %c0_59] : memref<7x8x16xf32, #tpu.memory_space<vmem>>, vector<1x8x16xf32>
    %143 = vector.shape_cast %142 : vector<1x8x16xf32> to vector<8x16xf32>
    %cst_60 = arith.constant dense<0.000000e+00> : vector<8x16xf32>
    %144 = tpu.matmul %143, %111, %cst_60 {dimension_numbers = #tpu.dot_dimension_numbers<[1], [0], [0], [1], [0, 0, 1, 1], [], []>} : vector<8x16xf32>, vector<16x16xf32>, vector<8x16xf32> -> vector<8x16xf32>
    %c4_61 = arith.constant 4 : index
    %c0_62 = arith.constant 0 : index
    %c0_63 = arith.constant 0 : index
    %145 = vector.load %arg5[%c4_61, %c0_62, %c0_63] : memref<7x16x16xf32, #tpu.memory_space<vmem>>, vector<1x16x16xf32>
    %146 = vector.shape_cast %145 : vector<1x16x16xf32> to vector<16x16xf32>
    %cst_64 = arith.constant dense<0.000000e+00> : vector<8x16xf32>
    %147 = tpu.matmul %144, %146, %cst_64 {dimension_numbers = #tpu.dot_dimension_numbers<[1], [0], [0], [1], [0, 0, 1, 1], [], []>} : vector<8x16xf32>, vector<16x16xf32>, vector<8x16xf32> -> vector<8x16xf32>
    %148 = arith.addf %134, %147 : vector<8x16xf32>
    %c5 = arith.constant 5 : index
    %c0_65 = arith.constant 0 : index
    %c0_66 = arith.constant 0 : index
    %149 = vector.load %arg2[%c5, %c0_65, %c0_66] : memref<7x8x16xf32, #tpu.memory_space<vmem>>, vector<1x8x16xf32>
    %150 = vector.shape_cast %149 : vector<1x8x16xf32> to vector<8x16xf32>
    %cst_67 = arith.constant dense<0.000000e+00> : vector<8x16xf32>
    %151 = tpu.matmul %150, %111, %cst_67 {dimension_numbers = #tpu.dot_dimension_numbers<[1], [0], [0], [1], [0, 0, 1, 1], [], []>} : vector<8x16xf32>, vector<16x16xf32>, vector<8x16xf32> -> vector<8x16xf32>
    %c5_68 = arith.constant 5 : index
    %c0_69 = arith.constant 0 : index
    %c0_70 = arith.constant 0 : index
    %152 = vector.load %arg5[%c5_68, %c0_69, %c0_70] : memref<7x16x16xf32, #tpu.memory_space<vmem>>, vector<1x16x16xf32>
    %153 = vector.shape_cast %152 : vector<1x16x16xf32> to vector<16x16xf32>
    %cst_71 = arith.constant dense<0.000000e+00> : vector<8x16xf32>
    %154 = tpu.matmul %151, %153, %cst_71 {dimension_numbers = #tpu.dot_dimension_numbers<[1], [0], [0], [1], [0, 0, 1, 1], [], []>} : vector<8x16xf32>, vector<16x16xf32>, vector<8x16xf32> -> vector<8x16xf32>
    %155 = arith.addf %141, %154 : vector<8x16xf32>
    %c6 = arith.constant 6 : index
    %c0_72 = arith.constant 0 : index
    %c0_73 = arith.constant 0 : index
    %156 = vector.load %arg2[%c6, %c0_72, %c0_73] : memref<7x8x16xf32, #tpu.memory_space<vmem>>, vector<1x8x16xf32>
    %157 = vector.shape_cast %156 : vector<1x8x16xf32> to vector<8x16xf32>
    %cst_74 = arith.constant dense<0.000000e+00> : vector<8x16xf32>
    %158 = tpu.matmul %157, %111, %cst_74 {dimension_numbers = #tpu.dot_dimension_numbers<[1], [0], [0], [1], [0, 0, 1, 1], [], []>} : vector<8x16xf32>, vector<16x16xf32>, vector<8x16xf32> -> vector<8x16xf32>
    %c6_75 = arith.constant 6 : index
    %c0_76 = arith.constant 0 : index
    %c0_77 = arith.constant 0 : index
    %159 = vector.load %arg5[%c6_75, %c0_76, %c0_77] : memref<7x16x16xf32, #tpu.memory_space<vmem>>, vector<1x16x16xf32>
    %160 = vector.shape_cast %159 : vector<1x16x16xf32> to vector<16x16xf32>
    %cst_78 = arith.constant dense<0.000000e+00> : vector<8x16xf32>
    %161 = tpu.matmul %158, %160, %cst_78 {dimension_numbers = #tpu.dot_dimension_numbers<[1], [0], [0], [1], [0, 0, 1, 1], [], []>} : vector<8x16xf32>, vector<16x16xf32>, vector<8x16xf32> -> vector<8x16xf32>
    %162 = arith.addf %148, %161 : vector<8x16xf32>
    %163 = arith.addf %162, %155 : vector<8x16xf32>
    %164 = vector.broadcast %110 : f32 to vector<8x16xf32>
    %165 = arith.addf %163, %164 : vector<8x16xf32>
    %166 = arith.negf %165 : vector<8x16xf32>
    %167 = math.exp %166 : vector<8x16xf32>
    %cst_79 = arith.constant 1.000000e+00 : f32
    %168 = vector.broadcast %cst_79 : f32 to vector<8x16xf32>
    %169 = arith.addf %168, %167 : vector<8x16xf32>
    %170 = arith.divf %168, %169 : vector<8x16xf32>
    %cst_80 = arith.constant 0.333333343 : f32
    %171 = vector.broadcast %cst_80 : f32 to vector<8x16xf32>
    %172 = arith.mulf %170, %171 : vector<8x16xf32>
    %c1_81 = arith.constant 1 : index
    %173 = memref.load %arg9[%c1_81] : memref<3xf32, #tpu.memory_space<smem>>
    %174 = tpu.concatenate %109, %5 in 0 : vector<8x16xf32>, vector<8x16xf32> -> vector<16x16xf32>
    %cst_82 = arith.constant 0.000000e+00 : f32
    %175 = vector.broadcast %cst_82 : f32 to vector<8x16xf32>
    %cst_83 = arith.constant 0.000000e+00 : f32
    %176 = vector.broadcast %cst_83 : f32 to vector<8x16xf32>
    %c0_84 = arith.constant 0 : index
    %c0_85 = arith.constant 0 : index
    %c0_86 = arith.constant 0 : index
    %177 = vector.load %arg3[%c0_84, %c0_85, %c0_86] : memref<7x8x16xf32, #tpu.memory_space<vmem>>, vector<1x8x16xf32>
    %178 = vector.shape_cast %177 : vector<1x8x16xf32> to vector<8x16xf32>
    %cst_87 = arith.constant dense<0.000000e+00> : vector<8x16xf32>
    %179 = tpu.matmul %178, %174, %cst_87 {dimension_numbers = #tpu.dot_dimension_numbers<[1], [0], [0], [1], [0, 0, 1, 1], [], []>} : vector<8x16xf32>, vector<16x16xf32>, vector<8x16xf32> -> vector<8x16xf32>
    %c0_88 = arith.constant 0 : index
    %c0_89 = arith.constant 0 : index
    %c0_90 = arith.constant 0 : index
    %180 = vector.load %arg6[%c0_88, %c0_89, %c0_90] : memref<7x16x16xf32, #tpu.memory_space<vmem>>, vector<1x16x16xf32>
    %181 = vector.shape_cast %180 : vector<1x16x16xf32> to vector<16x16xf32>
    %cst_91 = arith.constant dense<0.000000e+00> : vector<8x16xf32>
    %182 = tpu.matmul %179, %181, %cst_91 {dimension_numbers = #tpu.dot_dimension_numbers<[1], [0], [0], [1], [0, 0, 1, 1], [], []>} : vector<8x16xf32>, vector<16x16xf32>, vector<8x16xf32> -> vector<8x16xf32>
    %183 = arith.addf %175, %182 : vector<8x16xf32>
    %c1_92 = arith.constant 1 : index
    %c0_93 = arith.constant 0 : index
    %c0_94 = arith.constant 0 : index
    %184 = vector.load %arg3[%c1_92, %c0_93, %c0_94] : memref<7x8x16xf32, #tpu.memory_space<vmem>>, vector<1x8x16xf32>
    %185 = vector.shape_cast %184 : vector<1x8x16xf32> to vector<8x16xf32>
    %cst_95 = arith.constant dense<0.000000e+00> : vector<8x16xf32>
    %186 = tpu.matmul %185, %174, %cst_95 {dimension_numbers = #tpu.dot_dimension_numbers<[1], [0], [0], [1], [0, 0, 1, 1], [], []>} : vector<8x16xf32>, vector<16x16xf32>, vector<8x16xf32> -> vector<8x16xf32>
    %c1_96 = arith.constant 1 : index
    %c0_97 = arith.constant 0 : index
    %c0_98 = arith.constant 0 : index
    %187 = vector.load %arg6[%c1_96, %c0_97, %c0_98] : memref<7x16x16xf32, #tpu.memory_space<vmem>>, vector<1x16x16xf32>
    %188 = vector.shape_cast %187 : vector<1x16x16xf32> to vector<16x16xf32>
    %cst_99 = arith.constant dense<0.000000e+00> : vector<8x16xf32>
    %189 = tpu.matmul %186, %188, %cst_99 {dimension_numbers = #tpu.dot_dimension_numbers<[1], [0], [0], [1], [0, 0, 1, 1], [], []>} : vector<8x16xf32>, vector<16x16xf32>, vector<8x16xf32> -> vector<8x16xf32>
    %190 = arith.addf %176, %189 : vector<8x16xf32>
    %c2_100 = arith.constant 2 : index
    %c0_101 = arith.constant 0 : index
    %c0_102 = arith.constant 0 : index
    %191 = vector.load %arg3[%c2_100, %c0_101, %c0_102] : memref<7x8x16xf32, #tpu.memory_space<vmem>>, vector<1x8x16xf32>
    %192 = vector.shape_cast %191 : vector<1x8x16xf32> to vector<8x16xf32>
    %cst_103 = arith.constant dense<0.000000e+00> : vector<8x16xf32>
    %193 = tpu.matmul %192, %174, %cst_103 {dimension_numbers = #tpu.dot_dimension_numbers<[1], [0], [0], [1], [0, 0, 1, 1], [], []>} : vector<8x16xf32>, vector<16x16xf32>, vector<8x16xf32> -> vector<8x16xf32>
    %c2_104 = arith.constant 2 : index
    %c0_105 = arith.constant 0 : index
    %c0_106 = arith.constant 0 : index
    %194 = vector.load %arg6[%c2_104, %c0_105, %c0_106] : memref<7x16x16xf32, #tpu.memory_space<vmem>>, vector<1x16x16xf32>
    %195 = vector.shape_cast %194 : vector<1x16x16xf32> to vector<16x16xf32>
    %cst_107 = arith.constant dense<0.000000e+00> : vector<8x16xf32>
    %196 = tpu.matmul %193, %195, %cst_107 {dimension_numbers = #tpu.dot_dimension_numbers<[1], [0], [0], [1], [0, 0, 1, 1], [], []>} : vector<8x16xf32>, vector<16x16xf32>, vector<8x16xf32> -> vector<8x16xf32>
    %197 = arith.addf %183, %196 : vector<8x16xf32>
    %c3_108 = arith.constant 3 : index
    %c0_109 = arith.constant 0 : index
    %c0_110 = arith.constant 0 : index
    %198 = vector.load %arg3[%c3_108, %c0_109, %c0_110] : memref<7x8x16xf32, #tpu.memory_space<vmem>>, vector<1x8x16xf32>
    %199 = vector.shape_cast %198 : vector<1x8x16xf32> to vector<8x16xf32>
    %cst_111 = arith.constant dense<0.000000e+00> : vector<8x16xf32>
    %200 = tpu.matmul %199, %174, %cst_111 {dimension_numbers = #tpu.dot_dimension_numbers<[1], [0], [0], [1], [0, 0, 1, 1], [], []>} : vector<8x16xf32>, vector<16x16xf32>, vector<8x16xf32> -> vector<8x16xf32>
    %c3_112 = arith.constant 3 : index
    %c0_113 = arith.constant 0 : index
    %c0_114 = arith.constant 0 : index
    %201 = vector.load %arg6[%c3_112, %c0_113, %c0_114] : memref<7x16x16xf32, #tpu.memory_space<vmem>>, vector<1x16x16xf32>
    %202 = vector.shape_cast %201 : vector<1x16x16xf32> to vector<16x16xf32>
    %cst_115 = arith.constant dense<0.000000e+00> : vector<8x16xf32>
    %203 = tpu.matmul %200, %202, %cst_115 {dimension_numbers = #tpu.dot_dimension_numbers<[1], [0], [0], [1], [0, 0, 1, 1], [], []>} : vector<8x16xf32>, vector<16x16xf32>, vector<8x16xf32> -> vector<8x16xf32>
    %204 = arith.addf %190, %203 : vector<8x16xf32>
    %c4_116 = arith.constant 4 : index
    %c0_117 = arith.constant 0 : index
    %c0_118 = arith.constant 0 : index
    %205 = vector.load %arg3[%c4_116, %c0_117, %c0_118] : memref<7x8x16xf32, #tpu.memory_space<vmem>>, vector<1x8x16xf32>
    %206 = vector.shape_cast %205 : vector<1x8x16xf32> to vector<8x16xf32>
    %cst_119 = arith.constant dense<0.000000e+00> : vector<8x16xf32>
    %207 = tpu.matmul %206, %174, %cst_119 {dimension_numbers = #tpu.dot_dimension_numbers<[1], [0], [0], [1], [0, 0, 1, 1], [], []>} : vector<8x16xf32>, vector<16x16xf32>, vector<8x16xf32> -> vector<8x16xf32>
    %c4_120 = arith.constant 4 : index
    %c0_121 = arith.constant 0 : index
    %c0_122 = arith.constant 0 : index
    %208 = vector.load %arg6[%c4_120, %c0_121, %c0_122] : memref<7x16x16xf32, #tpu.memory_space<vmem>>, vector<1x16x16xf32>
    %209 = vector.shape_cast %208 : vector<1x16x16xf32> to vector<16x16xf32>
    %cst_123 = arith.constant dense<0.000000e+00> : vector<8x16xf32>
    %210 = tpu.matmul %207, %209, %cst_123 {dimension_numbers = #tpu.dot_dimension_numbers<[1], [0], [0], [1], [0, 0, 1, 1], [], []>} : vector<8x16xf32>, vector<16x16xf32>, vector<8x16xf32> -> vector<8x16xf32>
    %211 = arith.addf %197, %210 : vector<8x16xf32>
    %c5_124 = arith.constant 5 : index
    %c0_125 = arith.constant 0 : index
    %c0_126 = arith.constant 0 : index
    %212 = vector.load %arg3[%c5_124, %c0_125, %c0_126] : memref<7x8x16xf32, #tpu.memory_space<vmem>>, vector<1x8x16xf32>
    %213 = vector.shape_cast %212 : vector<1x8x16xf32> to vector<8x16xf32>
    %cst_127 = arith.constant dense<0.000000e+00> : vector<8x16xf32>
    %214 = tpu.matmul %213, %174, %cst_127 {dimension_numbers = #tpu.dot_dimension_numbers<[1], [0], [0], [1], [0, 0, 1, 1], [], []>} : vector<8x16xf32>, vector<16x16xf32>, vector<8x16xf32> -> vector<8x16xf32>
    %c5_128 = arith.constant 5 : index
    %c0_129 = arith.constant 0 : index
    %c0_130 = arith.constant 0 : index
    %215 = vector.load %arg6[%c5_128, %c0_129, %c0_130] : memref<7x16x16xf32, #tpu.memory_space<vmem>>, vector<1x16x16xf32>
    %216 = vector.shape_cast %215 : vector<1x16x16xf32> to vector<16x16xf32>
    %cst_131 = arith.constant dense<0.000000e+00> : vector<8x16xf32>
    %217 = tpu.matmul %214, %216, %cst_131 {dimension_numbers = #tpu.dot_dimension_numbers<[1], [0], [0], [1], [0, 0, 1, 1], [], []>} : vector<8x16xf32>, vector<16x16xf32>, vector<8x16xf32> -> vector<8x16xf32>
    %218 = arith.addf %204, %217 : vector<8x16xf32>
    %c6_132 = arith.constant 6 : index
    %c0_133 = arith.constant 0 : index
    %c0_134 = arith.constant 0 : index
    %219 = vector.load %arg3[%c6_132, %c0_133, %c0_134] : memref<7x8x16xf32, #tpu.memory_space<vmem>>, vector<1x8x16xf32>
    %220 = vector.shape_cast %219 : vector<1x8x16xf32> to vector<8x16xf32>
    %cst_135 = arith.constant dense<0.000000e+00> : vector<8x16xf32>
    %221 = tpu.matmul %220, %174, %cst_135 {dimension_numbers = #tpu.dot_dimension_numbers<[1], [0], [0], [1], [0, 0, 1, 1], [], []>} : vector<8x16xf32>, vector<16x16xf32>, vector<8x16xf32> -> vector<8x16xf32>
    %c6_136 = arith.constant 6 : index
    %c0_137 = arith.constant 0 : index
    %c0_138 = arith.constant 0 : index
    %222 = vector.load %arg6[%c6_136, %c0_137, %c0_138] : memref<7x16x16xf32, #tpu.memory_space<vmem>>, vector<1x16x16xf32>
    %223 = vector.shape_cast %222 : vector<1x16x16xf32> to vector<16x16xf32>
    %cst_139 = arith.constant dense<0.000000e+00> : vector<8x16xf32>
    %224 = tpu.matmul %221, %223, %cst_139 {dimension_numbers = #tpu.dot_dimension_numbers<[1], [0], [0], [1], [0, 0, 1, 1], [], []>} : vector<8x16xf32>, vector<16x16xf32>, vector<8x16xf32> -> vector<8x16xf32>
    %225 = arith.addf %211, %224 : vector<8x16xf32>
    %226 = arith.addf %225, %218 : vector<8x16xf32>
    %227 = vector.broadcast %173 : f32 to vector<8x16xf32>
    %228 = arith.addf %226, %227 : vector<8x16xf32>
    %229 = arith.negf %228 : vector<8x16xf32>
    %230 = math.exp %229 : vector<8x16xf32>
    %cst_140 = arith.constant 1.000000e+00 : f32
    %231 = vector.broadcast %cst_140 : f32 to vector<8x16xf32>
    %232 = arith.addf %231, %230 : vector<8x16xf32>
    %233 = arith.divf %231, %232 : vector<8x16xf32>
    %cst_141 = arith.constant 0.333333343 : f32
    %234 = vector.broadcast %cst_141 : f32 to vector<8x16xf32>
    %235 = arith.mulf %233, %234 : vector<8x16xf32>
    %c2_142 = arith.constant 2 : index
    %236 = memref.load %arg9[%c2_142] : memref<3xf32, #tpu.memory_space<smem>>
    %237 = tpu.concatenate %26, %45 in 0 : vector<16x16xf32>, vector<16x16xf32> -> vector<32x16xf32>
    %cst_143 = arith.constant 0.000000e+00 : f32
    %238 = vector.broadcast %cst_143 : f32 to vector<16x16xf32>
    %cst_144 = arith.constant 0.000000e+00 : f32
    %239 = vector.broadcast %cst_144 : f32 to vector<16x16xf32>
    %c0_145 = arith.constant 0 : index
    %c0_146 = arith.constant 0 : index
    %c0_147 = arith.constant 0 : index
    %240 = vector.load %arg4[%c0_145, %c0_146, %c0_147] : memref<7x16x32xf32, #tpu.memory_space<vmem>>, vector<1x16x32xf32>
    %241 = vector.shape_cast %240 : vector<1x16x32xf32> to vector<16x32xf32>
    %cst_148 = arith.constant dense<0.000000e+00> : vector<16x16xf32>
    %242 = tpu.matmul %241, %237, %cst_148 {dimension_numbers = #tpu.dot_dimension_numbers<[1], [0], [0], [1], [0, 0, 1, 1], [], []>} : vector<16x32xf32>, vector<32x16xf32>, vector<16x16xf32> -> vector<16x16xf32>
    %c0_149 = arith.constant 0 : index
    %c0_150 = arith.constant 0 : index
    %c0_151 = arith.constant 0 : index
    %243 = vector.load %arg5[%c0_149, %c0_150, %c0_151] : memref<7x16x16xf32, #tpu.memory_space<vmem>>, vector<1x16x16xf32>
    %244 = vector.shape_cast %243 : vector<1x16x16xf32> to vector<16x16xf32>
    %cst_152 = arith.constant dense<0.000000e+00> : vector<16x16xf32>
    %245 = tpu.matmul %242, %244, %cst_152 {dimension_numbers = #tpu.dot_dimension_numbers<[1], [0], [0], [1], [0, 0, 1, 1], [], []>} : vector<16x16xf32>, vector<16x16xf32>, vector<16x16xf32> -> vector<16x16xf32>
    %246 = arith.addf %238, %245 : vector<16x16xf32>
    %c1_153 = arith.constant 1 : index
    %c0_154 = arith.constant 0 : index
    %c0_155 = arith.constant 0 : index
    %247 = vector.load %arg4[%c1_153, %c0_154, %c0_155] : memref<7x16x32xf32, #tpu.memory_space<vmem>>, vector<1x16x32xf32>
    %248 = vector.shape_cast %247 : vector<1x16x32xf32> to vector<16x32xf32>
    %cst_156 = arith.constant dense<0.000000e+00> : vector<16x16xf32>
    %249 = tpu.matmul %248, %237, %cst_156 {dimension_numbers = #tpu.dot_dimension_numbers<[1], [0], [0], [1], [0, 0, 1, 1], [], []>} : vector<16x32xf32>, vector<32x16xf32>, vector<16x16xf32> -> vector<16x16xf32>
    %c1_157 = arith.constant 1 : index
    %c0_158 = arith.constant 0 : index
    %c0_159 = arith.constant 0 : index
    %250 = vector.load %arg5[%c1_157, %c0_158, %c0_159] : memref<7x16x16xf32, #tpu.memory_space<vmem>>, vector<1x16x16xf32>
    %251 = vector.shape_cast %250 : vector<1x16x16xf32> to vector<16x16xf32>
    %cst_160 = arith.constant dense<0.000000e+00> : vector<16x16xf32>
    %252 = tpu.matmul %249, %251, %cst_160 {dimension_numbers = #tpu.dot_dimension_numbers<[1], [0], [0], [1], [0, 0, 1, 1], [], []>} : vector<16x16xf32>, vector<16x16xf32>, vector<16x16xf32> -> vector<16x16xf32>
    %253 = arith.addf %239, %252 : vector<16x16xf32>
    %c2_161 = arith.constant 2 : index
    %c0_162 = arith.constant 0 : index
    %c0_163 = arith.constant 0 : index
    %254 = vector.load %arg4[%c2_161, %c0_162, %c0_163] : memref<7x16x32xf32, #tpu.memory_space<vmem>>, vector<1x16x32xf32>
    %255 = vector.shape_cast %254 : vector<1x16x32xf32> to vector<16x32xf32>
    %cst_164 = arith.constant dense<0.000000e+00> : vector<16x16xf32>
    %256 = tpu.matmul %255, %237, %cst_164 {dimension_numbers = #tpu.dot_dimension_numbers<[1], [0], [0], [1], [0, 0, 1, 1], [], []>} : vector<16x32xf32>, vector<32x16xf32>, vector<16x16xf32> -> vector<16x16xf32>
    %c2_165 = arith.constant 2 : index
    %c0_166 = arith.constant 0 : index
    %c0_167 = arith.constant 0 : index
    %257 = vector.load %arg5[%c2_165, %c0_166, %c0_167] : memref<7x16x16xf32, #tpu.memory_space<vmem>>, vector<1x16x16xf32>
    %258 = vector.shape_cast %257 : vector<1x16x16xf32> to vector<16x16xf32>
    %cst_168 = arith.constant dense<0.000000e+00> : vector<16x16xf32>
    %259 = tpu.matmul %256, %258, %cst_168 {dimension_numbers = #tpu.dot_dimension_numbers<[1], [0], [0], [1], [0, 0, 1, 1], [], []>} : vector<16x16xf32>, vector<16x16xf32>, vector<16x16xf32> -> vector<16x16xf32>
    %260 = arith.addf %246, %259 : vector<16x16xf32>
    %c3_169 = arith.constant 3 : index
    %c0_170 = arith.constant 0 : index
    %c0_171 = arith.constant 0 : index
    %261 = vector.load %arg4[%c3_169, %c0_170, %c0_171] : memref<7x16x32xf32, #tpu.memory_space<vmem>>, vector<1x16x32xf32>
    %262 = vector.shape_cast %261 : vector<1x16x32xf32> to vector<16x32xf32>
    %cst_172 = arith.constant dense<0.000000e+00> : vector<16x16xf32>
    %263 = tpu.matmul %262, %237, %cst_172 {dimension_numbers = #tpu.dot_dimension_numbers<[1], [0], [0], [1], [0, 0, 1, 1], [], []>} : vector<16x32xf32>, vector<32x16xf32>, vector<16x16xf32> -> vector<16x16xf32>
    %c3_173 = arith.constant 3 : index
    %c0_174 = arith.constant 0 : index
    %c0_175 = arith.constant 0 : index
    %264 = vector.load %arg5[%c3_173, %c0_174, %c0_175] : memref<7x16x16xf32, #tpu.memory_space<vmem>>, vector<1x16x16xf32>
    %265 = vector.shape_cast %264 : vector<1x16x16xf32> to vector<16x16xf32>
    %cst_176 = arith.constant dense<0.000000e+00> : vector<16x16xf32>
    %266 = tpu.matmul %263, %265, %cst_176 {dimension_numbers = #tpu.dot_dimension_numbers<[1], [0], [0], [1], [0, 0, 1, 1], [], []>} : vector<16x16xf32>, vector<16x16xf32>, vector<16x16xf32> -> vector<16x16xf32>
    %267 = arith.addf %253, %266 : vector<16x16xf32>
    %c4_177 = arith.constant 4 : index
    %c0_178 = arith.constant 0 : index
    %c0_179 = arith.constant 0 : index
    %268 = vector.load %arg4[%c4_177, %c0_178, %c0_179] : memref<7x16x32xf32, #tpu.memory_space<vmem>>, vector<1x16x32xf32>
    %269 = vector.shape_cast %268 : vector<1x16x32xf32> to vector<16x32xf32>
    %cst_180 = arith.constant dense<0.000000e+00> : vector<16x16xf32>
    %270 = tpu.matmul %269, %237, %cst_180 {dimension_numbers = #tpu.dot_dimension_numbers<[1], [0], [0], [1], [0, 0, 1, 1], [], []>} : vector<16x32xf32>, vector<32x16xf32>, vector<16x16xf32> -> vector<16x16xf32>
    %c4_181 = arith.constant 4 : index
    %c0_182 = arith.constant 0 : index
    %c0_183 = arith.constant 0 : index
    %271 = vector.load %arg5[%c4_181, %c0_182, %c0_183] : memref<7x16x16xf32, #tpu.memory_space<vmem>>, vector<1x16x16xf32>
    %272 = vector.shape_cast %271 : vector<1x16x16xf32> to vector<16x16xf32>
    %cst_184 = arith.constant dense<0.000000e+00> : vector<16x16xf32>
    %273 = tpu.matmul %270, %272, %cst_184 {dimension_numbers = #tpu.dot_dimension_numbers<[1], [0], [0], [1], [0, 0, 1, 1], [], []>} : vector<16x16xf32>, vector<16x16xf32>, vector<16x16xf32> -> vector<16x16xf32>
    %274 = arith.addf %260, %273 : vector<16x16xf32>
    %c5_185 = arith.constant 5 : index
    %c0_186 = arith.constant 0 : index
    %c0_187 = arith.constant 0 : index
    %275 = vector.load %arg4[%c5_185, %c0_186, %c0_187] : memref<7x16x32xf32, #tpu.memory_space<vmem>>, vector<1x16x32xf32>
    %276 = vector.shape_cast %275 : vector<1x16x32xf32> to vector<16x32xf32>
    %cst_188 = arith.constant dense<0.000000e+00> : vector<16x16xf32>
    %277 = tpu.matmul %276, %237, %cst_188 {dimension_numbers = #tpu.dot_dimension_numbers<[1], [0], [0], [1], [0, 0, 1, 1], [], []>} : vector<16x32xf32>, vector<32x16xf32>, vector<16x16xf32> -> vector<16x16xf32>
    %c5_189 = arith.constant 5 : index
    %c0_190 = arith.constant 0 : index
    %c0_191 = arith.constant 0 : index
    %278 = vector.load %arg5[%c5_189, %c0_190, %c0_191] : memref<7x16x16xf32, #tpu.memory_space<vmem>>, vector<1x16x16xf32>
    %279 = vector.shape_cast %278 : vector<1x16x16xf32> to vector<16x16xf32>
    %cst_192 = arith.constant dense<0.000000e+00> : vector<16x16xf32>
    %280 = tpu.matmul %277, %279, %cst_192 {dimension_numbers = #tpu.dot_dimension_numbers<[1], [0], [0], [1], [0, 0, 1, 1], [], []>} : vector<16x16xf32>, vector<16x16xf32>, vector<16x16xf32> -> vector<16x16xf32>
    %281 = arith.addf %267, %280 : vector<16x16xf32>
    %c6_193 = arith.constant 6 : index
    %c0_194 = arith.constant 0 : index
    %c0_195 = arith.constant 0 : index
    %282 = vector.load %arg4[%c6_193, %c0_194, %c0_195] : memref<7x16x32xf32, #tpu.memory_space<vmem>>, vector<1x16x32xf32>
    %283 = vector.shape_cast %282 : vector<1x16x32xf32> to vector<16x32xf32>
    %cst_196 = arith.constant dense<0.000000e+00> : vector<16x16xf32>
    %284 = tpu.matmul %283, %237, %cst_196 {dimension_numbers = #tpu.dot_dimension_numbers<[1], [0], [0], [1], [0, 0, 1, 1], [], []>} : vector<16x32xf32>, vector<32x16xf32>, vector<16x16xf32> -> vector<16x16xf32>
    %c6_197 = arith.constant 6 : index
    %c0_198 = arith.constant 0 : index
    %c0_199 = arith.constant 0 : index
    %285 = vector.load %arg5[%c6_197, %c0_198, %c0_199] : memref<7x16x16xf32, #tpu.memory_space<vmem>>, vector<1x16x16xf32>
    %286 = vector.shape_cast %285 : vector<1x16x16xf32> to vector<16x16xf32>
    %cst_200 = arith.constant dense<0.000000e+00> : vector<16x16xf32>
    %287 = tpu.matmul %284, %286, %cst_200 {dimension_numbers = #tpu.dot_dimension_numbers<[1], [0], [0], [1], [0, 0, 1, 1], [], []>} : vector<16x16xf32>, vector<16x16xf32>, vector<16x16xf32> -> vector<16x16xf32>
    %288 = arith.addf %274, %287 : vector<16x16xf32>
    %289 = arith.addf %288, %281 : vector<16x16xf32>
    %290 = vector.broadcast %236 : f32 to vector<16x16xf32>
    %291 = arith.addf %289, %290 : vector<16x16xf32>
    %292 = arith.negf %291 : vector<16x16xf32>
    %293 = math.exp %292 : vector<16x16xf32>
    %cst_201 = arith.constant 1.000000e+00 : f32
    %294 = vector.broadcast %cst_201 : f32 to vector<16x16xf32>
    %295 = arith.addf %294, %293 : vector<16x16xf32>
    %296 = arith.divf %294, %295 : vector<16x16xf32>
    %cst_202 = arith.constant 0.333333343 : f32
    %297 = vector.broadcast %cst_202 : f32 to vector<16x16xf32>
    %298 = arith.mulf %296, %297 : vector<16x16xf32>
    %299 = vector.extract_strided_slice %235 {offsets = [0, 0], sizes = [8, 1], strides = [1, 1]} : vector<8x16xf32> to vector<8x1xf32>
    %300 = vector.broadcast %299 : vector<8x1xf32> to vector<8x16xf32>
    %301 = arith.addf %172, %300 : vector<8x16xf32>
    %302 = vector.extract_strided_slice %298 {offsets = [0, 0], sizes = [1, 16], strides = [1, 1]} : vector<16x16xf32> to vector<1x16xf32>
    %303 = vector.broadcast %302 : vector<1x16xf32> to vector<8x16xf32>
    %304 = arith.addf %301, %303 : vector<8x16xf32>
    %c0_203 = arith.constant 0 : index
    %c0_204 = arith.constant 0 : index
    %c0_205 = arith.constant 0 : index
    %305 = vector.load %arg1[%c0_203, %c0_204, %c0_205] : memref<1x8x256xf32, #tpu.memory_space<vmem>>, vector<1x8x16xf32>
    %306 = vector.shape_cast %305 : vector<1x8x16xf32> to vector<8x16xf32>
    %307 = arith.mulf %306, %304 : vector<8x16xf32>
    %308 = vector.extract_strided_slice %235 {offsets = [0, 1], sizes = [8, 1], strides = [1, 1]} : vector<8x16xf32> to vector<8x1xf32>
    %309 = vector.broadcast %308 : vector<8x1xf32> to vector<8x16xf32>
    %310 = arith.addf %172, %309 : vector<8x16xf32>
    %311 = vector.extract_strided_slice %298 {offsets = [1, 0], sizes = [1, 16], strides = [1, 1]} : vector<16x16xf32> to vector<1x16xf32>
    %312 = vector.broadcast %311 : vector<1x16xf32> to vector<8x16xf32>
    %313 = arith.addf %310, %312 : vector<8x16xf32>
    %c0_206 = arith.constant 0 : index
    %c0_207 = arith.constant 0 : index
    %c16 = arith.constant 16 : index
    %314 = vector.load %arg1[%c0_206, %c0_207, %c16] : memref<1x8x256xf32, #tpu.memory_space<vmem>>, vector<1x8x16xf32>
    %315 = vector.shape_cast %314 : vector<1x8x16xf32> to vector<8x16xf32>
    %316 = arith.mulf %315, %313 : vector<8x16xf32>
    %317 = vector.extract_strided_slice %235 {offsets = [0, 2], sizes = [8, 1], strides = [1, 1]} : vector<8x16xf32> to vector<8x1xf32>
    %318 = vector.broadcast %317 : vector<8x1xf32> to vector<8x16xf32>
    %319 = arith.addf %172, %318 : vector<8x16xf32>
    %320 = vector.extract_strided_slice %298 {offsets = [2, 0], sizes = [1, 16], strides = [1, 1]} : vector<16x16xf32> to vector<1x16xf32>
    %321 = vector.broadcast %320 : vector<1x16xf32> to vector<8x16xf32>
    %322 = arith.addf %319, %321 : vector<8x16xf32>
    %c0_208 = arith.constant 0 : index
    %c0_209 = arith.constant 0 : index
    %c32 = arith.constant 32 : index
    %323 = vector.load %arg1[%c0_208, %c0_209, %c32] : memref<1x8x256xf32, #tpu.memory_space<vmem>>, vector<1x8x16xf32>
    %324 = vector.shape_cast %323 : vector<1x8x16xf32> to vector<8x16xf32>
    %325 = arith.mulf %324, %322 : vector<8x16xf32>
    %326 = vector.extract_strided_slice %235 {offsets = [0, 3], sizes = [8, 1], strides = [1, 1]} : vector<8x16xf32> to vector<8x1xf32>
    %327 = vector.broadcast %326 : vector<8x1xf32> to vector<8x16xf32>
    %328 = arith.addf %172, %327 : vector<8x16xf32>
    %329 = vector.extract_strided_slice %298 {offsets = [3, 0], sizes = [1, 16], strides = [1, 1]} : vector<16x16xf32> to vector<1x16xf32>
    %330 = vector.broadcast %329 : vector<1x16xf32> to vector<8x16xf32>
    %331 = arith.addf %328, %330 : vector<8x16xf32>
    %c0_210 = arith.constant 0 : index
    %c0_211 = arith.constant 0 : index
    %c48 = arith.constant 48 : index
    %332 = vector.load %arg1[%c0_210, %c0_211, %c48] : memref<1x8x256xf32, #tpu.memory_space<vmem>>, vector<1x8x16xf32>
    %333 = vector.shape_cast %332 : vector<1x8x16xf32> to vector<8x16xf32>
    %334 = arith.mulf %333, %331 : vector<8x16xf32>
    %335 = vector.extract_strided_slice %235 {offsets = [0, 4], sizes = [8, 1], strides = [1, 1]} : vector<8x16xf32> to vector<8x1xf32>
    %336 = vector.broadcast %335 : vector<8x1xf32> to vector<8x16xf32>
    %337 = arith.addf %172, %336 : vector<8x16xf32>
    %338 = vector.extract_strided_slice %298 {offsets = [4, 0], sizes = [1, 16], strides = [1, 1]} : vector<16x16xf32> to vector<1x16xf32>
    %339 = vector.broadcast %338 : vector<1x16xf32> to vector<8x16xf32>
    %340 = arith.addf %337, %339 : vector<8x16xf32>
    %c0_212 = arith.constant 0 : index
    %c0_213 = arith.constant 0 : index
    %c64 = arith.constant 64 : index
    %341 = vector.load %arg1[%c0_212, %c0_213, %c64] : memref<1x8x256xf32, #tpu.memory_space<vmem>>, vector<1x8x16xf32>
    %342 = vector.shape_cast %341 : vector<1x8x16xf32> to vector<8x16xf32>
    %343 = arith.mulf %342, %340 : vector<8x16xf32>
    %344 = vector.extract_strided_slice %235 {offsets = [0, 5], sizes = [8, 1], strides = [1, 1]} : vector<8x16xf32> to vector<8x1xf32>
    %345 = vector.broadcast %344 : vector<8x1xf32> to vector<8x16xf32>
    %346 = arith.addf %172, %345 : vector<8x16xf32>
    %347 = vector.extract_strided_slice %298 {offsets = [5, 0], sizes = [1, 16], strides = [1, 1]} : vector<16x16xf32> to vector<1x16xf32>
    %348 = vector.broadcast %347 : vector<1x16xf32> to vector<8x16xf32>
    %349 = arith.addf %346, %348 : vector<8x16xf32>
    %c0_214 = arith.constant 0 : index
    %c0_215 = arith.constant 0 : index
    %c80 = arith.constant 80 : index
    %350 = vector.load %arg1[%c0_214, %c0_215, %c80] : memref<1x8x256xf32, #tpu.memory_space<vmem>>, vector<1x8x16xf32>
    %351 = vector.shape_cast %350 : vector<1x8x16xf32> to vector<8x16xf32>
    %352 = arith.mulf %351, %349 : vector<8x16xf32>
    %353 = vector.extract_strided_slice %235 {offsets = [0, 6], sizes = [8, 1], strides = [1, 1]} : vector<8x16xf32> to vector<8x1xf32>
    %354 = vector.broadcast %353 : vector<8x1xf32> to vector<8x16xf32>
    %355 = arith.addf %172, %354 : vector<8x16xf32>
    %356 = vector.extract_strided_slice %298 {offsets = [6, 0], sizes = [1, 16], strides = [1, 1]} : vector<16x16xf32> to vector<1x16xf32>
    %357 = vector.broadcast %356 : vector<1x16xf32> to vector<8x16xf32>
    %358 = arith.addf %355, %357 : vector<8x16xf32>
    %c0_216 = arith.constant 0 : index
    %c0_217 = arith.constant 0 : index
    %c96 = arith.constant 96 : index
    %359 = vector.load %arg1[%c0_216, %c0_217, %c96] : memref<1x8x256xf32, #tpu.memory_space<vmem>>, vector<1x8x16xf32>
    %360 = vector.shape_cast %359 : vector<1x8x16xf32> to vector<8x16xf32>
    %361 = arith.mulf %360, %358 : vector<8x16xf32>
    %362 = vector.extract_strided_slice %235 {offsets = [0, 7], sizes = [8, 1], strides = [1, 1]} : vector<8x16xf32> to vector<8x1xf32>
    %363 = vector.broadcast %362 : vector<8x1xf32> to vector<8x16xf32>
    %364 = arith.addf %172, %363 : vector<8x16xf32>
    %365 = vector.extract_strided_slice %298 {offsets = [7, 0], sizes = [1, 16], strides = [1, 1]} : vector<16x16xf32> to vector<1x16xf32>
    %366 = vector.broadcast %365 : vector<1x16xf32> to vector<8x16xf32>
    %367 = arith.addf %364, %366 : vector<8x16xf32>
    %c0_218 = arith.constant 0 : index
    %c0_219 = arith.constant 0 : index
    %c112 = arith.constant 112 : index
    %368 = vector.load %arg1[%c0_218, %c0_219, %c112] : memref<1x8x256xf32, #tpu.memory_space<vmem>>, vector<1x8x16xf32>
    %369 = vector.shape_cast %368 : vector<1x8x16xf32> to vector<8x16xf32>
    %370 = arith.mulf %369, %367 : vector<8x16xf32>
    %371 = tpu.concatenate %307, %316, %325, %334, %343, %352, %361, %370 in 1 : vector<8x16xf32>, vector<8x16xf32>, vector<8x16xf32>, vector<8x16xf32>, vector<8x16xf32>, vector<8x16xf32>, vector<8x16xf32>, vector<8x16xf32> -> vector<8x128xf32>
    %c0_220 = arith.constant 0 : index
    %c0_221 = arith.constant 0 : index
    %c0_222 = arith.constant 0 : index
    %372 = vector.load %arg10[%c0_220, %c0_221, %c0_222] : memref<1x8x256xf32, #tpu.memory_space<vmem>>, vector<1x8x128xf32>
    %373 = vector.shape_cast %372 : vector<1x8x128xf32> to vector<8x128xf32>
    %374 = vector.shape_cast %371 : vector<8x128xf32> to vector<1x8x128xf32>
    tpu.vector_store %arg10[%c0_220, %c0_221, %c0_222], %374 {strides = array<i32>} : memref<1x8x256xf32, #tpu.memory_space<vmem>>, vector<1x8x128xf32>,
    %375 = vector.extract_strided_slice %235 {offsets = [0, 8], sizes = [8, 1], strides = [1, 1]} : vector<8x16xf32> to vector<8x1xf32>
    %376 = vector.broadcast %375 : vector<8x1xf32> to vector<8x16xf32>
    %377 = arith.addf %172, %376 : vector<8x16xf32>
    %378 = vector.extract_strided_slice %298 {offsets = [8, 0], sizes = [1, 16], strides = [1, 1]} : vector<16x16xf32> to vector<1x16xf32>
    %379 = vector.broadcast %378 : vector<1x16xf32> to vector<8x16xf32>
    %380 = arith.addf %377, %379 : vector<8x16xf32>
    %c0_223 = arith.constant 0 : index
    %c0_224 = arith.constant 0 : index
    %c128 = arith.constant 128 : index
    %381 = vector.load %arg1[%c0_223, %c0_224, %c128] : memref<1x8x256xf32, #tpu.memory_space<vmem>>, vector<1x8x16xf32>
    %382 = vector.shape_cast %381 : vector<1x8x16xf32> to vector<8x16xf32>
    %383 = arith.mulf %382, %380 : vector<8x16xf32>
    %384 = vector.extract_strided_slice %235 {offsets = [0, 9], sizes = [8, 1], strides = [1, 1]} : vector<8x16xf32> to vector<8x1xf32>
    %385 = vector.broadcast %384 : vector<8x1xf32> to vector<8x16xf32>
    %386 = arith.addf %172, %385 : vector<8x16xf32>
    %387 = vector.extract_strided_slice %298 {offsets = [9, 0], sizes = [1, 16], strides = [1, 1]} : vector<16x16xf32> to vector<1x16xf32>
    %388 = vector.broadcast %387 : vector<1x16xf32> to vector<8x16xf32>
    %389 = arith.addf %386, %388 : vector<8x16xf32>
    %c0_225 = arith.constant 0 : index
    %c0_226 = arith.constant 0 : index
    %c144 = arith.constant 144 : index
    %390 = vector.load %arg1[%c0_225, %c0_226, %c144] : memref<1x8x256xf32, #tpu.memory_space<vmem>>, vector<1x8x16xf32>
    %391 = vector.shape_cast %390 : vector<1x8x16xf32> to vector<8x16xf32>
    %392 = arith.mulf %391, %389 : vector<8x16xf32>
    %393 = vector.extract_strided_slice %235 {offsets = [0, 10], sizes = [8, 1], strides = [1, 1]} : vector<8x16xf32> to vector<8x1xf32>
    %394 = vector.broadcast %393 : vector<8x1xf32> to vector<8x16xf32>
    %395 = arith.addf %172, %394 : vector<8x16xf32>
    %396 = vector.extract_strided_slice %298 {offsets = [10, 0], sizes = [1, 16], strides = [1, 1]} : vector<16x16xf32> to vector<1x16xf32>
    %397 = vector.broadcast %396 : vector<1x16xf32> to vector<8x16xf32>
    %398 = arith.addf %395, %397 : vector<8x16xf32>
    %c0_227 = arith.constant 0 : index
    %c0_228 = arith.constant 0 : index
    %c160 = arith.constant 160 : index
    %399 = vector.load %arg1[%c0_227, %c0_228, %c160] : memref<1x8x256xf32, #tpu.memory_space<vmem>>, vector<1x8x16xf32>
    %400 = vector.shape_cast %399 : vector<1x8x16xf32> to vector<8x16xf32>
    %401 = arith.mulf %400, %398 : vector<8x16xf32>
    %402 = vector.extract_strided_slice %235 {offsets = [0, 11], sizes = [8, 1], strides = [1, 1]} : vector<8x16xf32> to vector<8x1xf32>
    %403 = vector.broadcast %402 : vector<8x1xf32> to vector<8x16xf32>
    %404 = arith.addf %172, %403 : vector<8x16xf32>
    %405 = vector.extract_strided_slice %298 {offsets = [11, 0], sizes = [1, 16], strides = [1, 1]} : vector<16x16xf32> to vector<1x16xf32>
    %406 = vector.broadcast %405 : vector<1x16xf32> to vector<8x16xf32>
    %407 = arith.addf %404, %406 : vector<8x16xf32>
    %c0_229 = arith.constant 0 : index
    %c0_230 = arith.constant 0 : index
    %c176 = arith.constant 176 : index
    %408 = vector.load %arg1[%c0_229, %c0_230, %c176] : memref<1x8x256xf32, #tpu.memory_space<vmem>>, vector<1x8x16xf32>
    %409 = vector.shape_cast %408 : vector<1x8x16xf32> to vector<8x16xf32>
    %410 = arith.mulf %409, %407 : vector<8x16xf32>
    %411 = vector.extract_strided_slice %235 {offsets = [0, 12], sizes = [8, 1], strides = [1, 1]} : vector<8x16xf32> to vector<8x1xf32>
    %412 = vector.broadcast %411 : vector<8x1xf32> to vector<8x16xf32>
    %413 = arith.addf %172, %412 : vector<8x16xf32>
    %414 = vector.extract_strided_slice %298 {offsets = [12, 0], sizes = [1, 16], strides = [1, 1]} : vector<16x16xf32> to vector<1x16xf32>
    %415 = vector.broadcast %414 : vector<1x16xf32> to vector<8x16xf32>
    %416 = arith.addf %413, %415 : vector<8x16xf32>
    %c0_231 = arith.constant 0 : index
    %c0_232 = arith.constant 0 : index
    %c192 = arith.constant 192 : index
    %417 = vector.load %arg1[%c0_231, %c0_232, %c192] : memref<1x8x256xf32, #tpu.memory_space<vmem>>, vector<1x8x16xf32>
    %418 = vector.shape_cast %417 : vector<1x8x16xf32> to vector<8x16xf32>
    %419 = arith.mulf %418, %416 : vector<8x16xf32>
    %420 = vector.extract_strided_slice %235 {offsets = [0, 13], sizes = [8, 1], strides = [1, 1]} : vector<8x16xf32> to vector<8x1xf32>
    %421 = vector.broadcast %420 : vector<8x1xf32> to vector<8x16xf32>
    %422 = arith.addf %172, %421 : vector<8x16xf32>
    %423 = vector.extract_strided_slice %298 {offsets = [13, 0], sizes = [1, 16], strides = [1, 1]} : vector<16x16xf32> to vector<1x16xf32>
    %424 = vector.broadcast %423 : vector<1x16xf32> to vector<8x16xf32>
    %425 = arith.addf %422, %424 : vector<8x16xf32>
    %c0_233 = arith.constant 0 : index
    %c0_234 = arith.constant 0 : index
    %c208 = arith.constant 208 : index
    %426 = vector.load %arg1[%c0_233, %c0_234, %c208] : memref<1x8x256xf32, #tpu.memory_space<vmem>>, vector<1x8x16xf32>
    %427 = vector.shape_cast %426 : vector<1x8x16xf32> to vector<8x16xf32>
    %428 = arith.mulf %427, %425 : vector<8x16xf32>
    %429 = vector.extract_strided_slice %235 {offsets = [0, 14], sizes = [8, 1], strides = [1, 1]} : vector<8x16xf32> to vector<8x1xf32>
    %430 = vector.broadcast %429 : vector<8x1xf32> to vector<8x16xf32>
    %431 = arith.addf %172, %430 : vector<8x16xf32>
    %432 = vector.extract_strided_slice %298 {offsets = [14, 0], sizes = [1, 16], strides = [1, 1]} : vector<16x16xf32> to vector<1x16xf32>
    %433 = vector.broadcast %432 : vector<1x16xf32> to vector<8x16xf32>
    %434 = arith.addf %431, %433 : vector<8x16xf32>
    %c0_235 = arith.constant 0 : index
    %c0_236 = arith.constant 0 : index
    %c224 = arith.constant 224 : index
    %435 = vector.load %arg1[%c0_235, %c0_236, %c224] : memref<1x8x256xf32, #tpu.memory_space<vmem>>, vector<1x8x16xf32>
    %436 = vector.shape_cast %435 : vector<1x8x16xf32> to vector<8x16xf32>
    %437 = arith.mulf %436, %434 : vector<8x16xf32>
    %438 = vector.extract_strided_slice %235 {offsets = [0, 15], sizes = [8, 1], strides = [1, 1]} : vector<8x16xf32> to vector<8x1xf32>
    %439 = vector.broadcast %438 : vector<8x1xf32> to vector<8x16xf32>
    %440 = arith.addf %172, %439 : vector<8x16xf32>
    %441 = vector.extract_strided_slice %298 {offsets = [15, 0], sizes = [1, 16], strides = [1, 1]} : vector<16x16xf32> to vector<1x16xf32>
    %442 = vector.broadcast %441 : vector<1x16xf32> to vector<8x16xf32>
    %443 = arith.addf %440, %442 : vector<8x16xf32>
    %c0_237 = arith.constant 0 : index
    %c0_238 = arith.constant 0 : index
    %c240 = arith.constant 240 : index
    %444 = vector.load %arg1[%c0_237, %c0_238, %c240] : memref<1x8x256xf32, #tpu.memory_space<vmem>>, vector<1x8x16xf32>
    %445 = vector.shape_cast %444 : vector<1x8x16xf32> to vector<8x16xf32>
    %446 = arith.mulf %445, %443 : vector<8x16xf32>
    %447 = tpu.concatenate %383, %392, %401, %410, %419, %428, %437, %446 in 1 : vector<8x16xf32>, vector<8x16xf32>, vector<8x16xf32>, vector<8x16xf32>, vector<8x16xf32>, vector<8x16xf32>, vector<8x16xf32>, vector<8x16xf32> -> vector<8x128xf32>
    %c0_239 = arith.constant 0 : index
    %c0_240 = arith.constant 0 : index
    %c128_241 = arith.constant 128 : index
    %448 = vector.load %arg10[%c0_239, %c0_240, %c128_241] : memref<1x8x256xf32, #tpu.memory_space<vmem>>, vector<1x8x128xf32>
    %449 = vector.shape_cast %448 : vector<1x8x128xf32> to vector<8x128xf32>
    %450 = vector.shape_cast %447 : vector<8x128xf32> to vector<1x8x128xf32>
    tpu.vector_store %arg10[%c0_239, %c0_240, %c128_241], %450 {strides = array<i32>} : memref<1x8x256xf32, #tpu.memory_space<vmem>>, vector<1x8x128xf32>,
    return
  }
  func.func @transform_0(%arg0: i32) -> (i32, i32, i32) {
    %c0_i32 = arith.constant 0 : i32
    %c0_i32_0 = arith.constant 0 : i32
    %c0_i32_1 = arith.constant 0 : i32
    return %arg0, %c0_i32, %c0_i32_0 : i32, i32, i32
  }
  func.func @transform_1(%arg0: i32) -> (i32, i32, i32) {
    %c0_i32 = arith.constant 0 : i32
    %c0_i32_0 = arith.constant 0 : i32
    %c0_i32_1 = arith.constant 0 : i32
    %c0_i32_2 = arith.constant 0 : i32
    return %c0_i32, %c0_i32_0, %c0_i32_1 : i32, i32, i32
  }
  func.func @transform_2(%arg0: i32) -> (i32, i32, i32) {
    %c0_i32 = arith.constant 0 : i32
    %c0_i32_0 = arith.constant 0 : i32
    %c0_i32_1 = arith.constant 0 : i32
    %c0_i32_2 = arith.constant 0 : i32
    return %c0_i32, %c0_i32_0, %c0_i32_1 : i32, i32, i32
  }
  func.func @transform_3(%arg0: i32) -> (i32, i32, i32) {
    %c0_i32 = arith.constant 0 : i32
    %c0_i32_0 = arith.constant 0 : i32
    %c0_i32_1 = arith.constant 0 : i32
    %c0_i32_2 = arith.constant 0 : i32
    return %c0_i32, %c0_i32_0, %c0_i32_1 : i32, i32, i32
  }
  func.func @transform_4(%arg0: i32) -> (i32, i32, i32) {
    %c0_i32 = arith.constant 0 : i32
    %c0_i32_0 = arith.constant 0 : i32
    %c0_i32_1 = arith.constant 0 : i32
    %c0_i32_2 = arith.constant 0 : i32
    return %c0_i32, %c0_i32_0, %c0_i32_1 : i32, i32, i32
  }
  func.func @transform_5(%arg0: i32) -> (i32, i32, i32) {
    %c0_i32 = arith.constant 0 : i32
    %c0_i32_0 = arith.constant 0 : i32
    %c0_i32_1 = arith.constant 0 : i32
    %c0_i32_2 = arith.constant 0 : i32
    return %c0_i32, %c0_i32_0, %c0_i32_1 : i32, i32, i32
  }
  func.func @transform_6(%arg0: i32) -> (i32, i32) {
    %c0_i32 = arith.constant 0 : i32
    %c0_i32_0 = arith.constant 0 : i32
    %c0_i32_1 = arith.constant 0 : i32
    return %c0_i32, %c0_i32_0 : i32, i32
  }
  func.func @transform_7(%arg0: i32) -> (i32, i32) {
    %c0_i32 = arith.constant 0 : i32
    %c0_i32_0 = arith.constant 0 : i32
    %c0_i32_1 = arith.constant 0 : i32
    return %c0_i32, %c0_i32_0 : i32, i32
  }
  func.func @transform_8(%arg0: i32) -> i32 {
    %c0_i32 = arith.constant 0 : i32
    %c0_i32_0 = arith.constant 0 : i32
    return %c0_i32 : i32
  }
  func.func @transform_9(%arg0: i32) -> (i32, i32, i32) {
    %c0_i32 = arith.constant 0 : i32
    %c0_i32_0 = arith.constant 0 : i32
    %c0_i32_1 = arith.constant 0 : i32
    return %arg0, %c0_i32, %c0_i32_0 : i32, i32, i32
  }
}

</mosaic_0001>

<bundles_post_ra>
// kernel: tpu_custom_call.1
= control target key start
LH: loop header
LB: loop body
LE: loop exit
PB: predicated region body
PF: predicated region fallthrough
CT: control target
= control target key end

     0   :  { %s6665_s0 = inlined_call_operand.vmem [shape: f32[2,8,256], index: 0, kind: input, shape index: {}]   ;;  %s6666_s1 = inlined_call_operand.vmem [shape: f32[7,8,16], index: 1, kind: input, shape index: {}]   ;;  %s6667_s2 = inlined_call_operand.vmem [shape: f32[7,8,16], index: 2, kind: input, shape index: {}]   ;;  %s6668_s3 = inlined_call_operand.vmem [shape: f32[7,16,32], index: 3, kind: input, shape index: {}]   ;;  %s6669_s4 = inlined_call_operand.vmem [shape: f32[7,16,16], index: 4, kind: input, shape index: {}]   ;;  %s6670_s5 = inlined_call_operand.vmem [shape: f32[7,16,16], index: 5, kind: input, shape index: {}]   ;;  %s6671_s6 = inlined_call_operand.vmem [shape: f32[256,16], index: 6, kind: input, shape index: {}]   ;;  %s6672_s7 = inlined_call_operand.vmem [shape: f32[256,16], index: 7, kind: input, shape index: {}]   ;;  %s6673_s8 = inlined_call_operand.vmem [shape: f32[3], index: 8, kind: input, shape index: {}]   ;;  %s6674_s9 = inlined_call_operand.hbm [shape: f32[2,8,256], index: 9, kind: output, shape index: {}]  }
   0x1   :  { %6689 = sst [smem:[#allocation8_spill]] %s6665_s0 }
   0x2   :  { %14 = vsyncpa [#allocation4], 0 }
   0x3   :  { %15 = vsyncpa [#allocation3], 0 }
   0x4   :  { %17 = vsyncpa [#allocation3 + $0x1], 0  ;;  %s5700_s30 = smov 0   ;;  %s5702_s10 = smov 0  }
   0x5   :  { %s5704_s11 = smov 0   ;;  %s5706_s12 = smov 0  }
   0x6 LB: > { %s5721_s13 = sadd.s32 4294967295, %s5620_s12   ;;  %s4479_s14 = sadd.s32 4294967294, %s5620_s12   ;;  %s5620_s12 = sphi %s5706_s12, %s6704_s12   ;;  %s5616_s11 = sphi %s5704_s11, %s6703_s11   ;;  %s5612_s10 = sphi %s5702_s10, %s6702_s10   ;;  %s5608_s30 = sphi %s5700_s30, %s6701_s30  }
   0x7   : > { %s5725_s15 = sadd.s32 1, %s5620_s12   ;;  %s224_s16 = sadd.s32 1, %s5616_s11 }
   0x8   : > { %s221_s17 = ssub.s32 %s5620_s12, %s5725_s15  ;;  %p234_p0 = scmp.ne.s32.totalorder %s5616_s11, %s5612_s10 }
   0x9   : > { %p222_p1 = scmp.eq.s32.totalorder %s221_s17, 0  ;;  %p235_p2 = scmp.eq.s32.totalorder %s5721_s13, 1 }
   0xa   : > { %p240_p3 = scmp.ne.s32.totalorder %s5612_s10, %s5608_s30  ;;  %p241_p4 = scmp.eq.s32.totalorder %s4479_s14, 1 }
   0xb   : > { %s5736_s18 = scalar_select %p222_p1, %s5616_s11, %s224_s16  }
   0xc   : > { %p5738_p5 = por %p235_p2, %p234_p0  ;;  %p5742_p6 = por %p241_p4, %p240_p3 }
   0xd   : > { %p4480_p7 = scmp.ge.s32.totalorder %s5620_s12, 1  ;;  %p248_p8 = scmp.lt.s32.totalorder %s5620_s12, 3 }
   0xe   : > { %p5409_p9 = scmp.eq.s32.totalorder %s5721_s13, 0  ;;  %s282_s24 = sshll.u32 %s6673_s8, 4  ;;  %s283_s24 = int_to_ptr.vmem [resolvable:$true] %s282_s24 }
   0xf   : > { %p5749_p10 = pnand %p4480_p7, %p248_p8  ;;  %s5539_s25 = scalar_lea.vmem %s283_s24, 16 }
  0x10   : > { %p5540_p13 = scmp.ne.s32.totalorder %s283_s24, %s5539_s25  ;;  %p5547_p3 = scmp.lt.s32.totalorder %s283_s24, %s283_s24 }
  0x11   : > { %p5401_p11 = pneg %p5749_p10  ;;  %p5548_p4 = scmp.lt.s32.totalorder %s5539_s25, %s5539_s25 }
  0x13   : > { %p5402_p12 = pnand %p5409_p9, %p5401_p11  ;;  %p5549_p7 = por %p5548_p4, %p5547_p3 }
  0x15   : > { %p5541_p0 = pneg %p5402_p12 }
  0x17   : > { %p5542_p1 = pnand %p5541_p0, %p5540_p13 }
  0x19   : > { %p5543_p2 = pneg %p5542_p1 }
  0x1b   : > { %p5550_p8 = pnand %p5549_p7, %p5543_p2 }
  0x1d   : > { %5553 = shalt.err (!%p5550_p8)
}
  0x1e   : > { %s5622_s26 = smov [#allocation2]   ;;  %303 = sbr.rel (%p5749_p10) target bundleno = 2387 (0x953), region = 56 }
  0x1f   : > { %5404 = dma.vmem_to_smem (!%p5402_p12), %s283_s24, 16, %s5622_s26, [#allocation4]  }
  0x25   : > { %5599 = dma.done.wait (%p5409_p9), [#allocation4], 16  }
  0x26   : > { %5601 = vsyncadd (%p5409_p9), [#allocation4], 4294967280 }
  0x27   : > { %309 = sfence }
  0x28   : > { %v363_v0 = vld [vmem:[%s6671_s6 + $0x80] sm:$0xff]  ;;  %v364_v1 = vld [vmem:[%s6671_s6 + $0x88] sm:$0xff]  ;;  %p340_p11 = scmp.lt.s32.totalorder %s5721_s13, 1  ;;  %v365_v5 = vld [vmem:[%s6671_s6 + $0x90] sm:$0xff]  ;;  %s6693_s0 = sld [smem:[#allocation8_spill]]  ;;  %vm5627_vm0 = vmmov 0  }
  0x29   : > { %v347_v2 = vld [vmem:[%s6671_s6] sm:$0xff]  ;;  %v5151_v3 = vpack.c.bf16 %v364_v1, %v363_v0  ;;  %v348_v4 = vld [vmem:[%s6671_s6 + $0x8] sm:$0xff]  ;;  %v366_v6 = vld [vmem:[%s6671_s6 + $0x98] sm:$0xff]  ;;  %s6675_s25 = smov 32   ;;  %s6679_s23 = smov 64   ;;  %vm700_vm1 = vcmask 130048  }
  0x2a   : > { %s341_s27 = scalar_select %p340_p11, %s5721_s13, 1  ;;  %v5153_v7 = vpack.c.bf16 %v348_v4, %v347_v2  ;;  %v5155_v8 = vpack.c.bf16 %v366_v6, %v365_v5  ;;  %v349_v9 = vld [vmem:[%s6671_s6 + $0x10] sm:$0xff]  ;;  %v350_v10 = vld [vmem:[%s6671_s6 + $0x18] sm:$0xff]  ;;  %v367_v11 = vld [vmem:[%s6671_s6 + $0xa0] sm:$0xff]  ;;  %vm704_vm2 = vcmask 261248   ;;  %vm713_vm3 = vcmask 392448  }
  0x2b   : > { %5152 = vmatprep.subr.bf16.mxu0 %v5151_v3  ;;  %v368_v12 = vld [vmem:[%s6671_s6 + $0xa8] sm:$0xff]  ;;  %v5157_v13 = vpack.c.bf16 %v350_v10, %v349_v9  ;;  %v351_v15 = vld [vmem:[%s6671_s6 + $0x20] sm:$0xff]  ;;  %v369_v18 = vld [vmem:[%s6671_s6 + $0xb0] sm:$0xff]  ;;  %s6694_s17 = smov 32   ;;  %s6683_s16 = smov 112   ;;  %vm717_vm4 = vcmask 523648  }
  0x2c   : > { %s4603_s24 = sshll.u32 %s341_s27, 4  ;;  %5154 = vmatpush3.bf16.msra.mxu0 %v5153_v7  ;;  %v5159_v14 = vpack.c.bf16 %v368_v12, %v367_v11  ;;  %v352_v16 = vld [vmem:[%s6671_s6 + $0x28] sm:$0xff]  ;;  %v370_v19 = vld [vmem:[%s6671_s6 + $0xb8] sm:$0xff]  ;;  %v353_v23 = vld [vmem:[%s6671_s6 + $0x30] sm:$0xff]  ;;  %vm729_vm5 = vcmask 786048   ;;  %vm725_vm6 = vcmask 654848  }
  0x2d   : > { %5156 = vmatprep.subr.bf16.mxu0 %v5155_v8  ;;  %v5161_v21 = vpack.c.bf16 %v352_v16, %v351_v15  ;;  %v5163_v22 = vpack.c.bf16 %v370_v19, %v369_v18  ;;  %v354_v24 = vld [vmem:[%s6671_s6 + $0x38] sm:$0xff]  ;;  %v371_v25 = vld [vmem:[%s6671_s6 + $0xc0] sm:$0xff]  ;;  %v372_v26 = vld [vmem:[%s6671_s6 + $0xc8] sm:$0xff]  ;;  %vm741_vm7 = vcmask 1048448   ;;  %vm737_vm8 = vcmask 917248   ;;  %s6695_s26 = smov 96  }
  0x2e   : > { %s5801_s28 = scalar_lea.vmem %s6693_s0, %s4603_s24  ;;  %s6677_s24 = smov 96   ;;  %v355_v27 = vld [vmem:[%s6671_s6 + $0x40] sm:$0xff]  ;;  %v356_v28 = vld [vmem:[%s6671_s6 + $0x48] sm:$0xff]  ;;  %v5165_v29 = vpack.c.bf16 %v354_v24, %v353_v23  ;;  %v373_v30 = vld [vmem:[%s6671_s6 + $0xd0] sm:$0xff]  ;;  %v5167_v34 = vpack.c.bf16 %v372_v26, %v371_v25  ;;  %vm788_vm9 = vcmask 7168   ;;  %vm790_vm10 = vcmask 15360  }
  0x2f   : > { %v5810_v17 = vld [vmem:[%s5801_s28] sm:$0xff]  ;;  %v5823_v20 = vld [vmem:[%s5801_s28 + $0x8] sm:$0xff]  ;;  %v467_v37 = vld [vmem:[%s6672_s7 + $0x90] sm:$0xff]  ;;  %v5169_v46 = vpack.c.bf16 %v356_v28, %v355_v27  ;;  %vm792_vm11 = vcmask 23552   ;;  %vm794_vm12 = vcmask 31744   ;;  %vm796_vm13 = vcmask 39936  }
  0x30   : > { %709 = vrot.lane.b32.xlu0 %v5810_v17, %s6677_s24  ;;  %733 = vrot.lane.b32.xlu1 %v5810_v17, %s6675_s25  ;;  %v465_v31 = vld [vmem:[%s6672_s7 + $0x80] sm:$0xff]  ;;  %v466_v32 = vld [vmem:[%s6672_s7 + $0x88] sm:$0xff]  ;;  %vm798_vm14 = vcmask 48128   ;;  %vm800_vm15 = vcmask 56320   ;;  %s6681_s29 = smov 80   ;;  %s6687_s22 = smov 16  }
  0x31   : > { %5158 = vmatpush3.bf16.msra.mxu0 %v5157_v13  ;;  %443 = vmatprep.mubr.f32.mxu0 %v5823_v20  ;;  %v449_v33 = vld [vmem:[%s6672_s7] sm:$0xff]  ;;  %v5183_v35 = vpack.c.bf16 %v466_v32, %v465_v31  ;;  %v450_v36 = vld [vmem:[%s6672_s7 + $0x8] sm:$0xff]  ;;  %v468_v38 = vld [vmem:[%s6672_s7 + $0x98] sm:$0xff]  ;;  %s4521_s0 = sld [smem:[#allocation2 + $0x1]]  ;;  %s818_s27 = sld [smem:[#allocation2]] }
  0x32   : > { %5160 = vmatprep.subr.bf16.mxu0 %v5159_v14  ;;  %545 = vmatprep.mubr.f32.mxu1 %v5823_v20  ;;  %v374_v39 = vld [vmem:[%s6671_s6 + $0xd8] sm:$0xff]  ;;  %v5185_v40 = vpack.c.bf16 %v450_v36, %v449_v33  ;;  %v5187_v41 = vpack.c.bf16 %v468_v38, %v467_v37  ;;  %v451_v42 = vld [vmem:[%s6672_s7 + $0x10] sm:$0xff]  ;;  %v469_v44 = vld [vmem:[%s6672_s7 + $0xa0] sm:$0xff]  ;;  %s6698_s21 = smov 16  }
  0x33   : > { %v452_v43 = vld [vmem:[%s6672_s7 + $0x18] sm:$0xff]  ;;  %v470_v45 = vld [vmem:[%s6672_s7 + $0xa8] sm:$0xff]  ;;  %5184 = vmatprep.subr.bf16.mxu1 %v5183_v35  ;;  %v5171_v47 = vpack.c.bf16 %v374_v39, %v373_v30  ;;  %v357_v48 = vld [vmem:[%s6671_s6 + $0x50] sm:$0xff] }
  0x34   : > { %721 = vrot.lane.b32.xlu0 %v5810_v17, %s6679_s23  ;;  %753 = vrot.lane.b32.xlu1 %v5823_v20, %s6677_s24  ;;  %v358_v49 = vld [vmem:[%s6671_s6 + $0x58] sm:$0xff]  ;;  %v375_v50 = vld [vmem:[%s6671_s6 + $0xe0] sm:$0xff]  ;;  %v5189_v51 = vpack.c.bf16 %v452_v43, %v451_v42  ;;  %v5191_v53 = vpack.c.bf16 %v470_v45, %v469_v44  ;;  %v5626_v43 = vmov 0.0|0.0   ;;  %v5628_v45 = vmov 0.0   ;;  %s6697_s24 = smov 80  }
  0x35   : > { %5162 = vmatpush3.bf16.msra.mxu0 %v5161_v21  ;;  %5186 = vmatpush3.bf16.msra.mxu1 %v5185_v40  ;;  %v376_v52 = vld [vmem:[%s6671_s6 + $0xe8] sm:$0xff]  ;;  %v453_v54 = vld [vmem:[%s6672_s7 + $0x20] sm:$0xff]  ;;  %v471_v56 = vld [vmem:[%s6672_s7 + $0xb0] sm:$0xff]  ;;  %v5173_v58 = vpack.c.bf16 %v358_v49, %v357_v48 }
  0x36   : > { %5164 = vmatprep.subr.bf16.mxu0 %v5163_v22  ;;  %5188 = vmatprep.subr.bf16.mxu1 %v5187_v41  ;;  %v454_v55 = vld [vmem:[%s6672_s7 + $0x28] sm:$0xff]  ;;  %v472_v57 = vld [vmem:[%s6672_s7 + $0xb8] sm:$0xff]  ;;  %v5175_v59 = vpack.c.bf16 %v376_v52, %v375_v50  ;;  %v359_v60 = vld [vmem:[%s6671_s6 + $0x60] sm:$0xff] }
  0x37   : > { %v360_v61 = vld [vmem:[%s6671_s6 + $0x68] sm:$0xff]  ;;  %v377_v62 = vld [vmem:[%s6671_s6 + $0xf0] sm:$0xff]  ;;  %v5193_v63 = vpack.c.bf16 %v454_v55, %v453_v54  ;;  %v378_v0 = vld [vmem:[%s6671_s6 + $0xf8] sm:$0xff]  ;;  %v5195_v1 = vpack.c.bf16 %v472_v57, %v471_v56 }
  0x38   : > { %763 = vrot.lane.b32.xlu0 %v5823_v20, %s6679_s23  ;;  %773 = vrot.lane.b32.xlu1 %v5823_v20, %s6694_s17  ;;  %v455_v2 = vld [vmem:[%s6672_s7 + $0x30] sm:$0xff]  ;;  %v456_v3 = vld [vmem:[%s6672_s7 + $0x38] sm:$0xff]  ;;  %v5177_v6 = vpack.c.bf16 %v360_v61, %v359_v60  ;;  %v5179_v7 = vpack.c.bf16 %v378_v0, %v377_v62  ;;  %s6685_s23 = smov 48  }
  0x39   : > { %5166 = vmatpush3.bf16.msra.mxu0 %v5165_v29  ;;  %5190 = vmatpush3.bf16.msra.mxu1 %v5189_v51  ;;  %v473_v4 = vld [vmem:[%s6672_s7 + $0xc0] sm:$0xff]  ;;  %v474_v5 = vld [vmem:[%s6672_s7 + $0xc8] sm:$0xff]  ;;  %v361_v8 = vld [vmem:[%s6671_s6 + $0x70] sm:$0xff]  ;;  %v5197_v10 = vpack.c.bf16 %v456_v3, %v455_v2  ;;  %v701_v2 = vsel %vm700_vm1, %v5810_v17, -inf  ;;  %v705_v3 = vsel %vm704_vm2, %v5810_v17, -inf }
  0x3a   : > { %5168 = vmatprep.subr.bf16.mxu0 %v5167_v34  ;;  %5192 = vmatprep.subr.bf16.mxu1 %v5191_v53  ;;  %v362_v9 = vld [vmem:[%s6671_s6 + $0x78] sm:$0xff]  ;;  %v5199_v11 = vpack.c.bf16 %v474_v5, %v473_v4  ;;  %v457_v12 = vld [vmem:[%s6672_s7 + $0x40] sm:$0xff]  ;;  %v458_v13 = vld [vmem:[%s6672_s7 + $0x48] sm:$0xff]  ;;  %v718_v4 = vsel %vm717_vm4, %v5810_v17, -inf  ;;  %v714_v5 = vsel %vm713_vm3, %v5810_v17, -inf }
  0x3b   : > { %v475_v14 = vld [vmem:[%s6672_s7 + $0xd0] sm:$0xff]  ;;  %v476_v15 = vld [vmem:[%s6672_s7 + $0xd8] sm:$0xff]  ;;  %v5181_v16 = vpack.c.bf16 %v362_v9, %v361_v8  ;;  %v5201_v18 = vpack.c.bf16 %v458_v13, %v457_v12  ;;  %v477_v23 = vld [vmem:[%s6672_s7 + $0xe0] sm:$0xff]  ;;  %v742_v8 = vsel %vm741_vm7, %v5810_v17, -inf  ;;  %v738_v9 = vsel %vm737_vm8, %v5810_v17, -inf }
  0x3c   : > { %v5203_v19 = vpack.c.bf16 %v476_v15, %v475_v14  ;;  %v459_v21 = vld [vmem:[%s6672_s7 + $0x50] sm:$0xff]  ;;  %v460_v22 = vld [vmem:[%s6672_s7 + $0x58] sm:$0xff]  ;;  %v478_v24 = vld [vmem:[%s6672_s7 + $0xe8] sm:$0xff]  ;;  %v760_v12 = vsel %vm717_vm4, %v5823_v20, -inf  ;;  %v757_v13 = vsel %vm713_vm3, %v5823_v20, -inf  ;;  %v770_v14 = vsel %vm729_vm5, %v5823_v20, -inf }
  0x3d   : > { %5170 = vmatpush3.bf16.msra.mxu0 %v5169_v46  ;;  %5194 = vmatpush3.bf16.msra.mxu1 %v5193_v63  ;;  %v5205_v25 = vpack.c.bf16 %v460_v22, %v459_v21  ;;  %v5207_v26 = vpack.c.bf16 %v478_v24, %v477_v23  ;;  %v461_v27 = vld [vmem:[%s6672_s7 + $0x60] sm:$0xff]  ;;  %v462_v28 = vld [vmem:[%s6672_s7 + $0x68] sm:$0xff]  ;;  %v479_v30 = vld [vmem:[%s6672_s7 + $0xf0] sm:$0xff]  ;;  %v767_v15 = vsel %vm725_vm6, %v5823_v20, -inf  ;;  %vm804_vm3 = vcmask 72704  }
  0x3e   : > { %5172 = vmatprep.subr.bf16.mxu0 %v5171_v47  ;;  %5196 = vmatprep.subr.bf16.mxu1 %v5195_v1  ;;  %v5209_v29 = vpack.c.bf16 %v462_v28, %v461_v27  ;;  %v480_v31 = vld [vmem:[%s6672_s7 + $0xf8] sm:$0xff]  ;;  %v463_v35 = vld [vmem:[%s6672_s7 + $0x70] sm:$0xff]  ;;  %v819_v57 = vld [vmem:[%s6666_s1] sm:$0xff]  ;;  %vm806_vm4 = vcmask 80896  }
  0x3f   : > { %v5211_v34 = vpack.c.bf16 %v480_v31, %v479_v30  ;;  %v464_v36 = vld [vmem:[%s6672_s7 + $0x78] sm:$0xff]  ;;  %v4493_v60 = vld [vmem:[%s6666_s1 + $0x10] sm:$0xff]  ;;  %v4495_v62 = vld [vmem:[%s6669_s4 + $0x20] sm:$0xff] }
  0x40   : > { %v5213_v37 = vpack.c.bf16 %v464_v36, %v463_v35  ;;  %v4496_v63 = vld [vmem:[%s6669_s4 + $0x28] sm:$0xff] }
  0x41   : > { %5174 = vmatpush3.bf16.msra.mxu0 %v5173_v58  ;;  %5198 = vmatpush3.bf16.msra.mxu1 %v5197_v10  ;;  %v893_v58 = vld [vmem:[%s6669_s4] sm:$0xff]  ;;  %v4489_v0 = vld [vmem:[%s6666_s1 + $0x8] sm:$0xff]  ;;  %v6035_v1 = vpack.c.bf16 %v4496_v63, %v4495_v62  ;;  %v749_v10 = vsel %vm704_vm2, %v5823_v20, -inf  ;;  %vm802_vm2 = vcmask 64512  }
  0x42   : > { %5176 = vmatprep.subr.bf16.mxu0 %v5175_v59  ;;  %5200 = vmatprep.subr.bf16.mxu1 %v5199_v11  ;;  %v894_v59 = vld [vmem:[%s6669_s4 + $0x8] sm:$0xff]  ;;  %v746_v11 = vsel %vm700_vm1, %v5823_v20, -inf }
  0x43   : > { %v6018_v61 = vpack.c.bf16 %v894_v59, %v893_v58 }
  0x45   : > { %5178 = vmatpush3.bf16.msra.mxu0 %v5177_v6  ;;  %5202 = vmatpush3.bf16.msra.mxu1 %v5201_v18  ;;  %v730_v6 = vsel %vm729_vm5, %v5810_v17, -inf  ;;  %v777_v18 = vsel %vm737_vm8, %v5823_v20, -inf  ;;  %vm808_vm5 = vcmask 89088   ;;  %vm814_vm8 = vcmask 113664  }
  0x46   : > { %5180 = vmatprep.subr.bf16.mxu0 %v5179_v7  ;;  %5204 = vmatprep.subr.bf16.mxu1 %v5203_v19  ;;  %v726_v7 = vsel %vm725_vm6, %v5810_v17, -inf  ;;  %vm810_vm6 = vcmask 97280  }
  0x49   : > { %5182 = vmatpush3.bf16.msra.mxu0 %v5181_v16  ;;  %5206 = vmatpush3.bf16.msra.mxu1 %v5205_v25  ;;  %v780_v16 = vsel %vm741_vm7, %v5823_v20, -inf  ;;  %v4491_v25 = vld [vmem:[%s6669_s4 + $0x10] sm:$0xff]  ;;  %vm812_vm7 = vcmask 105472  }
  0x4a   : > { %5208 = vmatprep.subr.bf16.mxu1 %v5207_v26  ;;  %5215 = vmatprep.subr.bf16.mxu0 %v5626_v43  ;;  %v4492_v26 = vld [vmem:[%s6669_s4 + $0x18] sm:$0xff] }
  0x4b   : > { %v6092_v30 = vpack.c.bf16 %v4492_v26, %v4491_v25  ;;  %v4508_v25 = vld [vmem:[%s6669_s4 + $0x48] sm:$0xff] }
  0x4c   : > { %444 = vmatmul.mubr.f32.vlgmr.msra.gmra.mrb[0].mxu0 %v5810_v17 }
  0x4d   : > { %5210 = vmatpush3.bf16.msra.mxu1 %v5209_v29  ;;  %4833 = vmatprep.mubr.msk.f32.mxu0 %vm5627_vm0, %v5628_v45  ;;  %v4499_v29 = vld [vmem:[%s6666_s1 + $0x18] sm:$0xff] }
  0x4e   : > { %5212 = vmatprep.subr.bf16.mxu1 %v5211_v34  ;;  %v4502_v34 = vld [vmem:[%s6669_s4 + $0x38] sm:$0xff] }
  0x51   : > { %5214 = vmatpush3.bf16.msra.mxu1 %v5213_v37 }
  0x52   : > { %5218 = vmatprep.subr.bf16.mxu1 %v5626_v43 }
  0x54   : > { %546 = vmatmul.mubr.f32.vlgmr.msra.gmra.mrb[0].mxu1 %v5810_v17 }
  0x55   : > { %4840 = vmatprep.mubr.msk.f32.mxu1 %vm5627_vm0, %v5628_v45 }
  0x5c   : > { %702 = vmax.xlane.f32.xlu1 %v701_v2 }
  0x60   : > { %719 = vmax.xlane.f32.xlu1 %v718_v4 }
  0x64   : > { %731 = vmax.xlane.f32.xlu1 %v730_v6 }
  0x68   : > { %743 = vmax.xlane.f32.xlu1 %v742_v8 }
  0x6c   : > { %750 = vmax.xlane.f32.xlu1 %v749_v10  ;;  %v4505_v10 = vld [vmem:[%s6666_s1 + $0x20] sm:$0xff] }
  0x70   : > { %761 = vmax.xlane.f32.xlu1 %v760_v12 }
  0x74   : > { %771 = vmax.xlane.f32.xlu1 %v770_v14 }
  0x78   : > { %781 = vmax.xlane.f32.xlu1 %v780_v16 }
  0xa2   : > { %v710_v32 = vpop.permute.xlu0 %709  ;;  %v734_v33 = vpop.permute.xlu1 %733 }
  0xa3   : > { %v712_v38 = vmax.f32 %v5810_v17, %v710_v32 }
  0xa6   : > { %v722_v39 = vpop.permute.xlu0 %721  ;;  %v754_v41 = vpop.permute.xlu1 %753 }
  0xa7   : > { %v724_v40 = vmax.f32 %v712_v38, %v722_v39 }
  0xa9   : > { %v736_v42 = vmax.f32 %v724_v40, %v734_v33  ;;  %v4501_v33 = vld [vmem:[%s6669_s4 + $0x30] sm:$0xff] }
  0xaa   : > { %v764_v46 = vpop.permute.xlu0 %763  ;;  %v774_v48 = vpop.permute.xlu1 %773  ;;  %v6109_v35 = vpack.c.bf16 %v4502_v34, %v4501_v33 }
  0xab   : > { %v745_v44 = vmax.f32 %v736_v42, %v5823_v20 }
  0xad   : > { %v756_v47 = vmax.f32 %v745_v44, %v754_v41 }
  0xaf   : > { %v766_v49 = vmax.f32 %v756_v47, %v764_v46 }
  0xb1   : > { %v776_v50 = vmax.f32 %v766_v49, %v774_v48 }
  0xb3   : > { %784 = vrot.lane.b32.xlu0 %v776_v50, %s6683_s16 }
  0xd2   : > { %706 = vmax.xlane.f32.xlu0 %v705_v3 }
  0xd6   : > { %715 = vmax.xlane.f32.xlu0 %v714_v5 }
  0xda   : > { %727 = vmax.xlane.f32.xlu0 %v726_v7 }
  0xde   : > { %739 = vmax.xlane.f32.xlu0 %v738_v9 }
  0xe2   : > { %747 = vmax.xlane.f32.xlu0 %v746_v11 }
  0xe6   : > { %758 = vmax.xlane.f32.xlu0 %v757_v13 }
  0xe9   : > { %v703_v37 = vpop.xlane.xlu1 %702 }
  0xea   : > { %768 = vmax.xlane.f32.xlu0 %v767_v15  ;;  %v4510_v15 = vld [vmem:[%s6666_s1 + $0x28] sm:$0xff] }
  0xed   : > { %v720_v41 = vpop.xlane.xlu1 %719 }
  0xee   : > { %778 = vmax.xlane.f32.xlu0 %v777_v18  ;;  %v4515_v18 = vld [vmem:[%s6666_s1 + $0x30] sm:$0xff] }
  0xf1   : > { %v732_v47 = vpop.xlane.xlu1 %731 }
 0x11f   : > { %v4637_v51 = vpop.f32.mrb[0].mxu0 }
 0x120   : > { %v4638_v52 = vpop.f32.mrb[1].mxu0 }
 0x121   : > { %v4639_v53 = vadd.f32 %v4638_v52, %v4637_v51  ;;  %v744_v51 = vpop.xlane.xlu1 %743 }
 0x125   : > { %v785_v54 = vpop.permute.xlu0 %784 }
 0x126   : > { %v787_v55 = vmax.f32 %v776_v50, %v785_v54 }
 0x127   : > { %v4672_v19 = vpop.f32.mrb[0].mxu1 }
 0x128   : > { %v5996_v56 = vpack.c.bf16 %v4639_v53, %v787_v55  ;;  %v4673_v21 = vpop.f32.mrb[1].mxu1  ;;  %v751_v55 = vpop.xlane.xlu1 %750 }
 0x129   : > { %v6074_v22 = vadd.f32 %v4673_v21, %v4672_v19  ;;  %v4527_v21 = vld [vmem:[%s6667_s2 + $0x10] sm:$0xff] }
 0x12a   : > { %5217 = vmatpush3.bf16.msra.mxu0 %v5996_v56  ;;  %5220 = vmatpush3.bf16.msra.mxu1 %v5996_v56 }
 0x12b   : > { %5221 = vmatprep.subr.bf16.mxu0 %v5626_v43  ;;  %5224 = vmatprep.subr.bf16.mxu1 %v5626_v43 }
 0x12c   : > { %v762_v63 = vpop.xlane.xlu1 %761 }
 0x12d   : > { %4834 = vmatmul.mubr.msk.f32.vlgmr.msra.gmra.mrb[2].mxu0 %vm700_vm1, %v819_v57  ;;  %4841 = vmatmul.mubr.msk.f32.vlgmr.msra.gmra.mrb[2].mxu1 %vm700_vm1, %v4489_v0 }
 0x12e   : > { %5223 = vmatpush3.bf16.msra.mxu0 %v5996_v56  ;;  %4847 = vmatprep.mubr.msk.f32.mxu0 %vm5627_vm0, %v5628_v45 }
 0x12f   : > { %5227 = vmatprep.subr.bf16.mxu0 %v5626_v43  ;;  %5226 = vmatpush3.bf16.msra.mxu1 %v6035_v1 }
 0x130   : > { %4854 = vmatprep.mubr.msk.f32.mxu1 %vm5627_vm0, %v5628_v45  ;;  %5230 = vmatprep.subr.bf16.mxu1 %v5626_v43  ;;  %v772_v7 = vpop.xlane.xlu1 %771 }
 0x131   : > { %4848 = vmatmul.mubr.msk.f32.vlgmr.msra.gmra.mrb[4].mxu0 %vm700_vm1, %v4493_v60 }
 0x132   : > { %5229 = vmatpush3.bf16.msra.mxu0 %v6018_v61  ;;  %4861 = vmatprep.mubr.msk.f32.mxu0 %vm5627_vm0, %v5628_v45 }
 0x133   : > { %5233 = vmatprep.subr.bf16.mxu0 %v5626_v43 }
 0x134   : > { %v782_v14 = vpop.xlane.xlu1 %781 }
 0x15f   : > { %v707_v36 = vpop.xlane.xlu0 %706 }
 0x160   : > { %v789_v38 = vsel %vm788_vm9, %v703_v37, %v707_v36  ;;  %vm816_vm9 = vcmask 121856  }
 0x163   : > { %v716_v39 = vpop.xlane.xlu0 %715 }
 0x164   : > { %v791_v40 = vsel %vm790_vm10, %v789_v38, %v716_v39  ;;  %vm619_vm10 = vcmask 1040384  }
 0x165   : > { %v793_v42 = vsel %vm792_vm11, %v791_v40, %v720_v41  ;;  %vm621_vm11 = vcmask 1041408  }
 0x167   : > { %v728_v44 = vpop.xlane.xlu0 %727 }
 0x168   : > { %v795_v46 = vsel %vm794_vm12, %v793_v42, %v728_v44  ;;  %vm623_vm12 = vcmask 1042432  }
 0x169   : > { %v797_v48 = vsel %vm796_vm13, %v795_v46, %v732_v47  ;;  %v4512_v47 = vld [vmem:[%s6669_s4 + $0x50] sm:$0xff]  ;;  %vm625_vm13 = vcmask 1043456  }
 0x16b   : > { %v740_v49 = vpop.xlane.xlu0 %739 }
 0x16c   : > { %v799_v50 = vsel %vm798_vm14, %v797_v48, %v740_v49  ;;  %v4513_v48 = vld [vmem:[%s6669_s4 + $0x58] sm:$0xff]  ;;  %vm627_vm14 = vcmask 1044480  }
 0x16d   : > { %v801_v52 = vsel %vm800_vm15, %v799_v50, %v744_v51  ;;  %vm629_vm15 = vcmask 1045504  }
 0x16f   : > { %v748_v53 = vpop.xlane.xlu0 %747 }
 0x170   : > { %v803_v54 = vsel %vm802_vm2, %v801_v52, %v748_v53  ;;  %v6208_v52 = vpack.c.bf16 %v4513_v48, %v4512_v47  ;;  %v4517_v53 = vld [vmem:[%s6669_s4 + $0x60] sm:$0xff]  ;;  %vm631_vm2 = vcmask 1046528  }
 0x171   : > { %v805_v57 = vsel %vm804_vm3, %v803_v54, %v751_v55  ;;  %v4518_v54 = vld [vmem:[%s6669_s4 + $0x68] sm:$0xff]  ;;  %vm2959_vm3 = vcmask 261120  }
 0x173   : > { %v759_v58 = vpop.xlane.xlu0 %758 }
 0x174   : > { %v807_v62 = vsel %vm806_vm4, %v805_v57, %v759_v58  ;;  %v6220_v58 = vpack.c.bf16 %v4518_v54, %v4517_v53  ;;  %vm4259_vm4 = vcmask 523264  }
 0x175   : > { %v809_v2 = vsel %vm808_vm5, %v807_v62, %v762_v63  ;;  %v4529_v62 = vld [vmem:[%s6670_s5 + $0x20] sm:$0xff]  ;;  %v4530_v63 = vld [vmem:[%s6670_s5 + $0x28] sm:$0xff]  ;;  %vm4261_vm5 = vcmask 654336  }
 0x177   : > { %v769_v3 = vpop.xlane.xlu0 %768 }
 0x178   : > { %v811_v6 = vsel %vm810_vm6, %v809_v2, %v769_v3  ;;  %v4523_v3 = vld [vmem:[%s6667_s2 + $0x8] sm:$0xff]  ;;  %vm4263_vm6 = vcmask 785408  }
 0x179   : > { %v813_v11 = vsel %vm812_vm7, %v811_v6, %v772_v7  ;;  %vm4265_vm7 = vcmask 916480  }
 0x17b   : > { %v779_v12 = vpop.xlane.xlu0 %778 }
 0x17c   : > { %v815_v13 = vsel %vm814_vm8, %v813_v11, %v779_v12 }
 0x17d   : > { %v817_v16 = vsel %vm816_vm9, %v815_v13, %v782_v14 }
 0x17e   : > { %v6140_v19 = vpack.c.bf16 %v6074_v22, %v817_v16 }
 0x200   : > { %v889_v23 = vpop.f32.mrb[2].mxu0  ;;  %v966_v31 = vpop.f32.mrb[2].mxu1 }
 0x201   : > { %v4835_v24 = vpop.f32.mrb[3].mxu0  ;;  %4862 = vmatmul.mubr.msk.f32.vlgmr.msra.gmra.mrb[6].mxu0 %vm700_vm1, %v889_v23  ;;  %v4842_v32 = vpop.f32.mrb[3].mxu1 }
 0x202   : > { %4875 = vmatprep.mubr.msk.f32.mxu0 %vm5627_vm0, %v5628_v45  ;;  %5235 = vmatpush3.bf16.msra.mxu0 %v6109_v35  ;;  %v4507_v24 = vld [vmem:[%s6669_s4 + $0x40] sm:$0xff]  ;;  %v557_v32 = vrot.slane %v5823_v20, 4 }
 0x203   : > { %5239 = vmatprep.subr.bf16.mxu0 %v5626_v43  ;;  %v6167_v26 = vpack.c.bf16 %v4508_v25, %v4507_v24  ;;  %v4535_v24 = vld [vmem:[%s6670_s5 + $0x30] sm:$0xff]  ;;  %v4536_v25 = vld [vmem:[%s6670_s5 + $0x38] sm:$0xff] }
 0x204   : > { %v1044_v27 = vpop.f32.mrb[4].mxu0  ;;  %v558_v34 = vmax.f32 %v5823_v20, %v557_v32  ;;  %v570_v11 = vadd.f32 %v557_v32, %v5823_v20  ;;  %v4526_v20 = vld [vmem:[%s6670_s5 + $0x18] sm:$0xff] }
 0x205   : > { %v4849_v28 = vpop.f32.mrb[5].mxu0  ;;  %4855 = vmatmul.mubr.msk.f32.vlgmr.msra.gmra.mrb[4].mxu1 %vm700_vm1, %v1044_v27  ;;  %v1962_v27 = vld [vmem:[%s6670_s5] sm:$0xff] }
 0x206   : > { %5232 = vmatpush3.bf16.msra.mxu1 %v5996_v56  ;;  %4868 = vmatprep.mubr.msk.f32.mxu1 %vm5627_vm0, %v5628_v45  ;;  %v1963_v28 = vld [vmem:[%s6670_s5 + $0x8] sm:$0xff]  ;;  %v559_v37 = vrot.slane %v558_v34, 2  ;;  %v571_v13 = vrot.slane %v570_v11, 2 }
 0x207   : > { %5236 = vmatprep.subr.bf16.mxu1 %v5626_v43 }
 0x208   : > { %v560_v39 = vmax.f32 %v558_v34, %v559_v37 }
 0x209   : > { %4869 = vmatmul.mubr.msk.f32.vlgmr.msra.gmra.mrb[6].mxu1 %vm700_vm1, %v4499_v29  ;;  %v5270_v29 = vpack.c.bf16 %v1963_v28, %v1962_v27  ;;  %v5276_v27 = vpack.c.bf16 %v4536_v25, %v4535_v24 }
 0x20a   : > { %5238 = vmatpush3.bf16.msra.mxu1 %v6092_v30  ;;  %4882 = vmatprep.mubr.msk.f32.mxu1 %vm5627_vm0, %v5628_v45  ;;  %v561_v41 = vrot.slane %v560_v39, 1 }
 0x20b   : > { %5242 = vmatprep.subr.bf16.mxu1 %v5626_v43 }
 0x20c   : > { %v6188_v44 = vmax.f32 %v560_v39, %v561_v41 }
 0x20d   : > { %4883 = vmatmul.mubr.msk.f32.vlgmr.msra.gmra.mrb[8].mxu1 %vm700_vm1, %v966_v31  ;;  %v551_v31 = vrot.slane %v5810_v17, 4 }
 0x20e   : > { %4896 = vmatprep.mubr.msk.f32.mxu1 %vm5627_vm0, %v5628_v45  ;;  %5244 = vmatpush3.bf16.msra.mxu1 %v6167_v26 }
 0x20f   : > { %5248 = vmatprep.subr.bf16.mxu1 %v5626_v43  ;;  %v552_v33 = vmax.f32 %v5810_v17, %v551_v31  ;;  %v564_v12 = vadd.f32 %v551_v31, %v5810_v17  ;;  %v4525_v17 = vld [vmem:[%s6670_s5 + $0x10] sm:$0xff] }
 0x211   : > { %v553_v36 = vrot.slane %v552_v33, 2  ;;  %v565_v14 = vrot.slane %v564_v12, 2 }
 0x213   : > { %v554_v38 = vmax.f32 %v552_v33, %v553_v36  ;;  %v566_v16 = vadd.f32 %v565_v14, %v564_v12 }
 0x215   : > { %v555_v40 = vrot.slane %v554_v38, 1 }
 0x217   : > { %v6186_v42 = vmax.f32 %v554_v38, %v555_v40 }
 0x219   : > { %v6192_v46 = vpack.i.bf16 %v6188_v44, %v6186_v42 }
 0x21b   : > { %5477 = vrot.lane.b32.xlu1 %v6192_v46, %s6695_s26  ;;  %5472 = vrot.lane.b32.xlu0 %v6192_v46, %s6683_s16 }
 0x21f   : > { %5482 = vrot.lane.b32.xlu1 %v6192_v46, %s6681_s29  ;;  %s6696_s29 = smov 64  }
 0x28d   : > { %v5478_v28 = vpop.permute.xlu1 %5477  ;;  %v5473_v31 = vpop.permute.xlu0 %5472 }
 0x28e   : > { %v5474_v48 = vunpack.i.l.bf16 %v5473_v31 }
 0x2d4   : > { %v1193_v59 = vpop.f32.mrb[6].mxu0 }
 0x2d5   : > { %v4863_v60 = vpop.f32.mrb[7].mxu0 }
 0x2d8   : > { %v1120_v0 = vpop.f32.mrb[4].mxu1 }
 0x2d9   : > { %v6113_v4 = vadd.f32 %v1193_v59, %v1120_v0  ;;  %v4856_v5 = vpop.f32.mrb[5].mxu1 }
 0x2da   : > { %v5267_v5 = vpack.c.bf16 %v4530_v63, %v4529_v62  ;;  %v620_v62 = vsel %vm619_vm10, %v6186_v42, %v5474_v48 }
 0x2dc   : > { %v1268_v8 = vpop.f32.mrb[6].mxu1 }
 0x2dd   : > { %v4870_v9 = vpop.f32.mrb[7].mxu1  ;;  %4876 = vmatmul.mubr.msk.f32.vlgmr.msra.gmra.mrb[8].mxu0 %vm700_vm1, %v1268_v8 }
 0x2de   : > { %5241 = vmatpush3.bf16.msra.mxu0 %v5996_v56  ;;  %4889 = vmatprep.mubr.msk.f32.mxu0 %vm5627_vm0, %v5628_v45 }
 0x2df   : > { %5245 = vmatprep.subr.bf16.mxu0 %v5626_v43 }
 0x2e0   : > { %v1417_v22 = vpop.f32.mrb[8].mxu1 }
 0x2e1   : > { %4890 = vmatmul.mubr.msk.f32.vlgmr.msra.gmra.mrb[10].mxu0 %vm700_vm1, %v4505_v10  ;;  %v4884_v23 = vpop.f32.mrb[9].mxu1  ;;  %v4533_v10 = vld [vmem:[%s6667_s2 + $0x18] sm:$0xff] }
 0x2e2   : > { %5247 = vmatpush3.bf16.msra.mxu0 %v5996_v56  ;;  %4903 = vmatprep.mubr.msk.f32.mxu0 %vm5627_vm0, %v5628_v45  ;;  %v5279_v23 = vpack.c.bf16 %v4526_v20, %v4525_v17 }
 0x2e3   : > { %5251 = vmatprep.subr.bf16.mxu0 %v5626_v43 }
 0x2e5   : > { %4904 = vmatmul.mubr.msk.f32.vlgmr.msra.gmra.mrb[12].mxu0 %vm700_vm1, %v4510_v15  ;;  %v572_v15 = vadd.f32 %v571_v13, %v570_v11 }
 0x2e6   : > { %5253 = vmatpush3.bf16.msra.mxu0 %v5996_v56  ;;  %4917 = vmatprep.mubr.msk.f32.mxu0 %vm5627_vm0, %v5628_v45  ;;  %v1888_v56 = vld [vmem:[%s6667_s2] sm:$0xff] }
 0x2e7   : > { %5257 = vmatprep.subr.bf16.mxu0 %v5626_v43 }
 0x2e9   : > { %4918 = vmatmul.mubr.msk.f32.vlgmr.msra.gmra.mrb[14].mxu0 %vm700_vm1, %v4515_v18  ;;  %v573_v18 = vrot.slane %v572_v15, 1 }
 0x2ea   : > { %5259 = vmatpush3.bf16.msra.mxu0 %v6140_v19  ;;  %4931 = vmatprep.mubr.msk.f32.mxu0 %vm5627_vm0, %v5628_v45 }
 0x2eb   : > { %5263 = vmatprep.subr.bf16.mxu0 %v5626_v43 }
 0x2ed   : > { %4932 = vmatmul.mubr.msk.f32.vlgmr.msra.gmra.mrb[16].mxu0 %vm700_vm1, %v1888_v56  ;;  %v567_v56 = vrot.slane %v566_v16, 1 }
 0x2ee   : > { %5265 = vmatpush3.bf16.msra.mxu0 %v6140_v19  ;;  %4945 = vmatprep.mubr.msk.f32.mxu0 %vm5627_vm0, %v5628_v45 }
 0x2ef   : > { %5269 = vmatprep.subr.bf16.mxu0 %v5626_v43 }
 0x2f1   : > { %4946 = vmatmul.mubr.msk.f32.vlgmr.msra.gmra.mrb[18].mxu0 %vm700_vm1, %v4527_v21  ;;  %v574_v21 = vadd.f32 %v573_v18, %v572_v15 }
 0x2f2   : > { %4959 = vmatprep.mubr.msk.f32.mxu0 %vm5627_vm0, %v5628_v45  ;;  %5271 = vmatpush3.bf16.msra.mxu0 %v5270_v29  ;;  %v5483_v29 = vpop.permute.xlu1 %5482 }
 0x2f3   : > { %5275 = vmatprep.subr.bf16.mxu0 %v5626_v43  ;;  %663 = vrot.lane.b32.xlu1 %v574_v21, %s6683_s16 }
 0x365   : > { %v664_v32 = vpop.permute.xlu1 %663 }
 0x3b0   : > { %v1344_v49 = vpop.f32.mrb[8].mxu0 }
 0x3b1   : > { %v6206_v50 = vadd.f32 %v1417_v22, %v1344_v49  ;;  %v4877_v51 = vpop.f32.mrb[9].mxu0  ;;  %v568_v22 = vadd.f32 %v567_v56, %v566_v16  ;;  %v5475_v49 = vunpack.i.h.bf16 %v5473_v31 }
 0x3b3   : > { %641 = vrot.lane.b32.xlu0 %v568_v22, %s6683_s16  ;;  %644 = vrot.lane.b32.xlu1 %v568_v22, %s6695_s26  ;;  %v633_v63 = vsel %vm619_vm10, %v6188_v44, %v5475_v49 }
 0x3b4   : > { %v1492_v55 = vpop.f32.mrb[10].mxu0 }
 0x3b5   : > { %v4891_v57 = vpop.f32.mrb[11].mxu0  ;;  %4897 = vmatmul.mubr.msk.f32.vlgmr.msra.gmra.mrb[10].mxu1 %vm700_vm1, %v1492_v55  ;;  %v5479_v55 = vunpack.i.l.bf16 %v5478_v28 }
 0x3b6   : > { %5250 = vmatpush3.bf16.msra.mxu1 %v6208_v52  ;;  %4910 = vmatprep.mubr.msk.f32.mxu1 %vm5627_vm0, %v5628_v45 }
 0x3b7   : > { %5254 = vmatprep.subr.bf16.mxu1 %v5626_v43  ;;  %5487 = vrot.lane.b32.xlu0 %v6192_v46, %s6696_s29 }
 0x3b8   : > { %v1644_v59 = vpop.f32.mrb[12].mxu0  ;;  %5492 = vrot.lane.b32.xlu1 %v6192_v46, %s6685_s23 }
 0x3b9   : > { %v4905_v60 = vpop.f32.mrb[13].mxu0  ;;  %4911 = vmatmul.mubr.msk.f32.vlgmr.msra.gmra.mrb[12].mxu1 %vm700_vm1, %v1644_v59 }
 0x3ba   : > { %5256 = vmatpush3.bf16.msra.mxu1 %v6220_v58  ;;  %4924 = vmatprep.mubr.msk.f32.mxu1 %vm5627_vm0, %v5628_v45  ;;  %v5480_v60 = vunpack.i.h.bf16 %v5478_v28 }
 0x3bb   : > { %5260 = vmatprep.subr.bf16.mxu1 %v5626_v43  ;;  %666 = vrot.lane.b32.xlu0 %v574_v21, %s6695_s26 }
 0x3bc   : > { %v1796_v0 = vpop.f32.mrb[14].mxu0  ;;  %669 = vrot.lane.b32.xlu1 %v574_v21, %s6697_s24 }
 0x3bd   : > { %v4919_v2 = vpop.f32.mrb[15].mxu0  ;;  %4925 = vmatmul.mubr.msk.f32.vlgmr.msra.gmra.mrb[14].mxu1 %vm700_vm1, %v1796_v0  ;;  %v691_v0 = vsel %vm619_vm10, %v574_v21, %v664_v32 }
 0x3be   : > { %5262 = vmatpush3.bf16.msra.mxu1 %v6140_v19  ;;  %4938 = vmatprep.mubr.msk.f32.mxu1 %vm5627_vm0, %v5628_v45 }
 0x3bf   : > { %5266 = vmatprep.subr.bf16.mxu1 %v5626_v43  ;;  %647 = vrot.lane.b32.xlu0 %v568_v22, %s6697_s24 }
 0x3c0   : > { %v1958_v6 = vpop.f32.mrb[16].mxu0  ;;  %650 = vrot.lane.b32.xlu1 %v568_v22, %s6696_s29 }
 0x3c1   : > { %v4933_v7 = vpop.f32.mrb[17].mxu0  ;;  %4939 = vmatmul.mubr.msk.f32.vlgmr.msra.gmra.mrb[16].mxu1 %vm700_vm1, %v4523_v3  ;;  %4960 = vmatmul.mubr.msk.f32.vlgmr.msra.gmra.mrb[20].mxu0 %vm700_vm1, %v1958_v6  ;;  %v5485_v6 = vunpack.i.h.bf16 %v5483_v29 }
 0x3c2   : > { %5268 = vmatpush3.bf16.msra.mxu1 %v5267_v5  ;;  %4952 = vmatprep.mubr.msk.f32.mxu1 %vm5627_vm0, %v5628_v45  ;;  %v5484_v7 = vunpack.i.l.bf16 %v5483_v29 }
 0x3c3   : > { %5272 = vmatprep.subr.bf16.mxu1 %v5626_v43  ;;  %4973 = vmatprep.mubr.msk.f32.mxu0 %vm5627_vm0, %v5628_v45 }
 0x3c4   : > { %v2113_v8 = vpop.f32.mrb[18].mxu0  ;;  %5497 = vrot.lane.b32.xlu0 %v6192_v46, %s6694_s17  ;;  %5277 = vmatpush3.bf16.msra.mxu0 %v5276_v27 }
 0x3c5   : > { %v4947_v9 = vpop.f32.mrb[19].mxu0  ;;  %4953 = vmatmul.mubr.msk.f32.vlgmr.msra.gmra.mrb[18].mxu1 %vm700_vm1, %v2113_v8  ;;  %5281 = vmatprep.subr.bf16.mxu0 %v5626_v43  ;;  %v622_v8 = vsel %vm621_vm11, %v620_v62, %v5479_v55 }
 0x3c6   : > { %5274 = vmatpush3.bf16.msra.mxu1 %v6140_v19  ;;  %4966 = vmatprep.mubr.msk.f32.mxu1 %vm5627_vm0, %v5628_v45  ;;  %v624_v56 = vsel %vm623_vm12, %v622_v8, %v5484_v7 }
 0x3c7   : > { %5278 = vmatprep.subr.bf16.mxu1 %v5626_v43  ;;  %5502 = vrot.lane.b32.xlu1 %v6192_v46, %s6687_s22 }
 0x3c8   : > { %672 = vrot.lane.b32.xlu0 %v574_v21, %s6696_s29 }
 0x3c9   : > { %4967 = vmatmul.mubr.msk.f32.vlgmr.msra.gmra.mrb[20].mxu1 %vm700_vm1, %v4533_v10 }
 0x3ca   : > { %4980 = vmatprep.mubr.msk.f32.mxu1 %vm5627_vm0, %v5628_v45  ;;  %5280 = vmatpush3.bf16.msra.mxu1 %v5279_v23 }
 0x3cb   : > { %5284 = vmatprep.subr.bf16.mxu1 %v5626_v43  ;;  %675 = vrot.lane.b32.xlu1 %v574_v21, %s6685_s23 }
 0x3cc   : > { %653 = vrot.lane.b32.xlu0 %v568_v22, %s6685_s23  ;;  %s4555_s23 = sld [smem:[#allocation2 + $0x2]] }
 0x3cf   : > { %678 = vrot.lane.b32.xlu1 %v574_v21, %s6694_s17 }
 0x3d0   : > { %656 = vrot.lane.b32.xlu0 %v568_v22, %s6694_s17 }
 0x3d3   : > { %681 = vrot.lane.b32.xlu1 %v574_v21, %s6687_s22 }
 0x3d4   : > { %659 = vrot.lane.b32.xlu0 %v568_v22, %s6687_s22 }
 0x425   : > { %v642_v33 = vpop.permute.xlu0 %641  ;;  %v645_v34 = vpop.permute.xlu1 %644 }
 0x429   : > { %v5488_v36 = vpop.permute.xlu0 %5487 }
 0x42a   : > { %v6302_v37 = vpop.permute.xlu1 %5492  ;;  %v5490_v42 = vunpack.i.h.bf16 %v5488_v36  ;;  %v5489_v14 = vunpack.i.l.bf16 %v5488_v36 }
 0x42b   : > { %v5495_v24 = vunpack.i.h.bf16 %v6302_v37  ;;  %v5494_v25 = vunpack.i.l.bf16 %v6302_v37 }
 0x42c   : > { %v626_v27 = vsel %vm625_vm13, %v624_v56, %v5489_v14  ;;  %v4571_v14 = vld [vmem:[%s6668_s3 + $0x38] sm:$0xff] }
 0x42d   : > { %v667_v38 = vpop.permute.xlu0 %666 }
 0x42e   : > { %v670_v39 = vpop.permute.xlu1 %669  ;;  %v692_v12 = vsel %vm621_vm11, %v691_v0, %v667_v38 }
 0x431   : > { %v648_v40 = vpop.permute.xlu0 %647 }
 0x432   : > { %v651_v51 = vpop.permute.xlu1 %650 }
 0x436   : > { %v6305_v53 = vpop.permute.xlu0 %5497 }
 0x437   : > { %v5500_v37 = vunpack.i.h.bf16 %v6305_v53 }
 0x439   : > { %v6310_v2 = vpop.permute.xlu1 %5502 }
 0x43a   : > { %v673_v3 = vpop.permute.xlu0 %672  ;;  %v5505_v49 = vunpack.i.h.bf16 %v6310_v2 }
 0x43d   : > { %v676_v44 = vpop.permute.xlu1 %675 }
 0x43e   : > { %v654_v15 = vpop.permute.xlu0 %653 }
 0x441   : > { %v679_v32 = vpop.permute.xlu1 %678 }
 0x488   : > { %v1568_v41 = vpop.f32.mrb[10].mxu1 }
 0x489   : > { %v1572_v46 = vadd.f32 %v1568_v41, %v6113_v4  ;;  %v4898_v47 = vpop.f32.mrb[11].mxu1  ;;  %v684_v4 = vsel %vm619_vm10, %v568_v22, %v642_v33  ;;  %v693_v22 = vsel %vm623_vm12, %v692_v12, %v670_v39  ;;  %v657_v33 = vpop.permute.xlu0 %656  ;;  %v5499_v39 = vunpack.i.l.bf16 %v6305_v53  ;;  %v4563_v12 = vld [vmem:[%s6668_s3 + $0x28] sm:$0xff] }
 0x48a   : > { %v685_v11 = vsel %vm621_vm11, %v684_v4, %v645_v34  ;;  %v694_v31 = vsel %vm625_vm13, %v693_v22, %v673_v3 }
 0x48b   : > { %v686_v17 = vsel %vm623_vm12, %v685_v11, %v648_v40  ;;  %v628_v40 = vsel %vm627_vm14, %v626_v27, %v5494_v25  ;;  %v4562_v11 = vld [vmem:[%s6668_s3 + $0x20] sm:$0xff] }
 0x48c   : > { %v1720_v54 = vpop.f32.mrb[12].mxu1  ;;  %v687_v29 = vsel %vm625_vm13, %v686_v17, %v651_v51  ;;  %v5504_v51 = vunpack.i.l.bf16 %v6310_v2  ;;  %v630_v53 = vsel %vm629_vm15, %v628_v40, %v5499_v39  ;;  %v4546_v17 = vld [vmem:[%s6670_s5 + $0x50] sm:$0xff] }
 0x48d   : > { %v1724_v57 = vadd.f32 %v1720_v54, %v6206_v50  ;;  %v4912_v59 = vpop.f32.mrb[13].mxu1  ;;  %v634_v50 = vsel %vm621_vm11, %v633_v63, %v5480_v60  ;;  %v688_v47 = vsel %vm627_vm14, %v687_v29, %v654_v15  ;;  %v682_v54 = vpop.permute.xlu1 %681  ;;  %v4539_v63 = vld [vmem:[%s6667_s2 + $0x20] sm:$0xff]  ;;  %v4579_v15 = vld [vmem:[%s6668_s3 + $0x48] sm:$0xff] }
 0x48e   : > { %v635_v21 = vsel %vm623_vm12, %v634_v50, %v5485_v6  ;;  %v689_v60 = vsel %vm629_vm15, %v688_v47, %v657_v33  ;;  %v660_v62 = vpop.permute.xlu0 %659  ;;  %v632_v0 = vsel %vm631_vm2, %v630_v53, %v5504_v51  ;;  %v2957_v50 = vld [vmem:[%s6668_s3] sm:$0xff]  ;;  %v4552_v29 = vld [vmem:[%s6670_s5 + $0x68] sm:$0xff] }
 0x48f   : > { %v636_v28 = vsel %vm625_vm13, %v635_v21, %v5490_v42  ;;  %v690_v3 = vsel %vm631_vm2, %v689_v60, %v660_v62  ;;  %v4570_v42 = vld [vmem:[%s6668_s3 + $0x30] sm:$0xff]  ;;  %v4590_v51 = vld [vmem:[%s6668_s3 + $0x60] sm:$0xff] }
 0x490   : > { %v1872_v5 = vpop.f32.mrb[14].mxu1  ;;  %v637_v41 = vsel %vm627_vm14, %v636_v28, %v5495_v24  ;;  %v698_v8 = vmul.f32 0.125, %v690_v3  ;;  %v4551_v28 = vld [vmem:[%s6670_s5 + $0x60] sm:$0xff] }
 0x491   : > { %v1876_v9 = vadd.f32 %v1872_v5, %v1572_v46  ;;  %v4926_v10 = vpop.f32.mrb[15].mxu1  ;;  %v695_v46 = vsel %vm627_vm14, %v694_v31, %v676_v44  ;;  %v4544_v5 = vld [vmem:[%s6667_s2 + $0x28] sm:$0xff]  ;;  %v4578_v44 = vld [vmem:[%s6668_s3 + $0x40] sm:$0xff]  ;;  %v5297_v33 = vpack.c.bf16 %v4552_v29, %v4551_v28 }
 0x492   : > { %v696_v59 = vsel %vm629_vm15, %v695_v46, %v679_v32 }
 0x493   : > { %v6312_v13 = vadd.f32 %v1876_v9, %v1724_v57  ;;  %v638_v57 = vsel %vm629_vm15, %v637_v41, %v5500_v37  ;;  %v697_v2 = vsel %vm631_vm2, %v696_v59, %v682_v54  ;;  %v4549_v9 = vld [vmem:[%s6667_s2 + $0x30] sm:$0xff]  ;;  %v5633_v54 = vmov 1  }
 0x494   : > { %v2035_v16 = vpop.f32.mrb[16].mxu1  ;;  %v2262_v18 = vpop.f32.mrb[20].mxu0  ;;  %v639_v4 = vsel %vm631_vm2, %v638_v57, %v5505_v49  ;;  %v699_v6 = vmul.f32 0.125, %v697_v2  ;;  %v4558_v37 = vld [vmem:[%s6668_s3 + $0x10] sm:$0xff]  ;;  %5507 = vset.pattern.permute.xlu1 %v5633_v54  ;;  %v2947_v2 = vstv %s4521_s0  ;;  %s6699_s0 = smov 48  }
 0x495   : > { %v4940_v20 = vpop.f32.mrb[17].mxu1  ;;  %v4961_v23 = vpop.f32.mrb[21].mxu0  ;;  %4981 = vmatmul.mubr.msk.f32.vlgmr.msra.gmra.mrb[22].mxu1 %vm700_vm1, %v2035_v16  ;;  %v6357_v7 = vpack.c.bf16 %v639_v4, %v632_v0  ;;  %v4541_v16 = vld [vmem:[%s6670_s5 + $0x40] sm:$0xff] }
 0x496   : > { %4994 = vmatprep.mubr.msk.f32.mxu1 %vm5627_vm0, %v5628_v45  ;;  %v6366_v10 = vpack.c.bf16 %v699_v6, %v698_v8  ;;  %v4547_v20 = vld [vmem:[%s6670_s5 + $0x58] sm:$0xff] }
 0x497   : > { %v5291_v27 = vpack.c.bf16 %v4547_v20, %v4546_v17  ;;  %v5647_v17 = vmov 14  }
 0x498   : > { %v2189_v34 = vpop.f32.mrb[18].mxu1 }
 0x499   : > { %v6327_v36 = vadd.f32 %v2262_v18, %v2189_v34  ;;  %v4954_v38 = vpop.f32.mrb[19].mxu1  ;;  %v4542_v18 = vld [vmem:[%s6670_s5 + $0x48] sm:$0xff] }
 0x49a   : > { %v5285_v56 = vpack.c.bf16 %v4542_v18, %v4541_v16  ;;  %v5642_v16 = vmov 8   ;;  %v5643_v18 = vmov 10  }
 0x49c   : > { %v2337_v48 = vpop.f32.mrb[20].mxu1  ;;  %5286 = vmatpush3.bf16.msra.mxu1 %v5285_v56  ;;  %v5644_v56 = vmov 11  }
 0x49d   : > { %v4968_v55 = vpop.f32.mrb[21].mxu1  ;;  %4974 = vmatmul.mubr.msk.f32.vlgmr.msra.gmra.mrb[22].mxu0 %vm700_vm1, %v2337_v48  ;;  %5290 = vmatprep.subr.bf16.mxu1 %v5626_v43 }
 0x49e   : > { %5283 = vmatpush3.bf16.msra.mxu0 %v6140_v19  ;;  %4987 = vmatprep.mubr.msk.f32.mxu0 %vm5627_vm0, %v5628_v45  ;;  %v5634_v55 = vmov 0  }
 0x49f   : > { %5287 = vmatprep.subr.bf16.mxu0 %v5626_v43  ;;  %5506 = vset.pattern.permute.xlu0 %v5634_v55  ;;  %v4143_v55 = vlaneseq }
 0x4a1   : > { %4988 = vmatmul.mubr.msk.f32.vlgmr.msra.gmra.mrb[24].mxu0 %vm700_vm1, %v4539_v63 }
 0x4a2   : > { %5289 = vmatpush3.bf16.msra.mxu0 %v6140_v19  ;;  %5001 = vmatprep.mubr.msk.f32.mxu0 %vm5627_vm0, %v5628_v45 }
 0x4a3   : > { %5293 = vmatprep.subr.bf16.mxu0 %v5626_v43 }
 0x4a5   : > { %5002 = vmatmul.mubr.msk.f32.vlgmr.msra.gmra.mrb[26].mxu0 %vm700_vm1, %v4544_v5 }
 0x4a6   : > { %5295 = vmatpush3.bf16.msra.mxu0 %v6140_v19  ;;  %5015 = vmatprep.mubr.msk.f32.mxu0 %vm5627_vm0, %v5628_v45  ;;  %v2958_v19 = vld [vmem:[%s6668_s3 + $0x8] sm:$0xff] }
 0x4a7   : > { %5300 = vmatprep.subr.bf16.mxu0 %v6357_v7 }
 0x4a9   : > { %5016 = vmatmul.mubr.msk.f32.vlgmr.msra.gmra.mrb[28].mxu0 %vm700_vm1, %v4549_v9 }
 0x4aa   : > { %5302 = vmatpush3.bf16.msra.mxu0 %v6357_v7  ;;  %5033 = vmatprep.mubr.msk.f32.mxu0 %vm2959_vm3, %v2957_v50 }
 0x4ab   : > { %5304 = vmatprep.subr.bf16.mxu0 %v6366_v10 }
 0x4ae   : > { %5306 = vmatpush3.bf16.msra.mxu0 %v6366_v10 }
 0x4af   : > { %5316 = vmatprep.subr.bf16.mxu0 %v6357_v7 }
 0x4b1   : > { %5034 = vmatmul.mubr.msk.f32.vlgmr.msra.gmra.mrb[30].mxu0 %vm2959_vm3, %v2958_v19 }
 0x4b2   : > { %5318 = vmatpush3.bf16.msra.mxu0 %v6357_v7  ;;  %5055 = vmatprep.mubr.msk.f32.mxu0 %vm2959_vm3, %v4562_v11 }
 0x4b3   : > { %5320 = vmatprep.subr.bf16.mxu0 %v6366_v10 }
 0x4b6   : > { %5322 = vmatpush3.bf16.msra.mxu0 %v6366_v10 }
 0x4b7   : > { %5332 = vmatprep.subr.bf16.mxu0 %v6357_v7 }
 0x4b9   : > { %5056 = vmatmul.mubr.msk.f32.vlgmr.msra.gmra.mrb[32].mxu0 %vm2959_vm3, %v4563_v12  ;;  %v5636_v12 = vmov 2  }
 0x4ba   : > { %5334 = vmatpush3.bf16.msra.mxu0 %v6357_v7  ;;  %5080 = vmatprep.mubr.msk.f32.mxu0 %vm2959_vm3, %v4570_v42  ;;  %v5637_v42 = vmov 4  }
 0x4bb   : > { %5336 = vmatprep.subr.bf16.mxu0 %v6366_v10 }
 0x4be   : > { %5338 = vmatpush3.bf16.msra.mxu0 %v6366_v10 }
 0x4bf   : > { %5348 = vmatprep.subr.bf16.mxu0 %v6357_v7 }
 0x4c1   : > { %5081 = vmatmul.mubr.msk.f32.vlgmr.msra.gmra.mrb[34].mxu0 %vm2959_vm3, %v4571_v14  ;;  %v5639_v14 = vmov 5  }
 0x4c2   : > { %5350 = vmatpush3.bf16.msra.mxu0 %v6357_v7  ;;  %5105 = vmatprep.mubr.msk.f32.mxu0 %vm2959_vm3, %v4578_v44  ;;  %v5640_v44 = vmov 6  }
 0x4c3   : > { %5352 = vmatprep.subr.bf16.mxu0 %v6366_v10 }
 0x4c6   : > { %5354 = vmatpush3.bf16.msra.mxu0 %v6366_v10 }
 0x4c7   : > { %5372 = vmatprep.subr.bf16.mxu0 %v6357_v7 }
 0x4c9   : > { %5106 = vmatmul.mubr.msk.f32.vlgmr.msra.gmra.mrb[36].mxu0 %vm2959_vm3, %v4579_v15  ;;  %v5641_v15 = vmov 7  }
 0x4ca   : > { %5374 = vmatpush3.bf16.msra.mxu0 %v6357_v7  ;;  %5141 = vmatprep.mubr.msk.f32.mxu0 %vm2959_vm3, %v4590_v51 }
 0x4cb   : > { %5376 = vmatprep.subr.bf16.mxu0 %v6366_v10 }
 0x4ce   : > { %5378 = vmatpush3.bf16.msra.mxu0 %v6366_v10 }
 0x568   : > { %v2486_v21 = vpop.f32.mrb[22].mxu1 }
 0x569   : > { %v4982_v22 = vpop.f32.mrb[23].mxu1 }
 0x56a   : > { %v5646_v22 = vmov 13  }
 0x570   : > { %v2413_v23 = vpop.f32.mrb[22].mxu0 }
 0x571   : > { %v6434_v24 = vadd.f32 %v2486_v21, %v2413_v23  ;;  %v4975_v25 = vpop.f32.mrb[23].mxu0  ;;  %v5645_v21 = vmov 12  }
 0x574   : > { %v2561_v31 = vpop.f32.mrb[24].mxu0 }
 0x575   : > { %v4989_v32 = vpop.f32.mrb[25].mxu0  ;;  %4995 = vmatmul.mubr.msk.f32.vlgmr.msra.gmra.mrb[24].mxu1 %vm700_vm1, %v2561_v31  ;;  %v1878_v31 = vstv %s818_s27 }
 0x576   : > { %5292 = vmatpush3.bf16.msra.mxu1 %v5291_v27  ;;  %5008 = vmatprep.mubr.msk.f32.mxu1 %vm5627_vm0, %v5628_v45  ;;  %v5648_v27 = vmov 15  }
 0x577   : > { %5296 = vmatprep.subr.bf16.mxu1 %v5626_v43  ;;  %v4559_v43 = vld [vmem:[%s6668_s3 + $0x18] sm:$0xff] }
 0x578   : > { %v2713_v34 = vpop.f32.mrb[26].mxu0 }
 0x579   : > { %v5003_v38 = vpop.f32.mrb[27].mxu0  ;;  %5009 = vmatmul.mubr.msk.f32.vlgmr.msra.gmra.mrb[26].mxu1 %vm700_vm1, %v2713_v34 }
 0x57a   : > { %5298 = vmatpush3.bf16.msra.mxu1 %v5297_v33  ;;  %5022 = vmatprep.mubr.msk.f32.mxu1 %vm5627_vm0, %v5628_v45  ;;  %v1879_v33 = vadd.f32 %v1878_v31, %v6312_v13  ;;  %vm4257_vm0 = vcmask 392192  }
 0x57b   : > { %5308 = vmatprep.subr.bf16.mxu1 %v6357_v7 }
 0x57c   : > { %v2865_v39 = vpop.f32.mrb[28].mxu0  ;;  %v4520_v34 = vmul.f32 -1.442695, %v1879_v33 }
 0x57d   : > { %v5017_v40 = vpop.f32.mrb[29].mxu0  ;;  %5023 = vmatmul.mubr.msk.f32.vlgmr.msra.gmra.mrb[28].mxu1 %vm700_vm1, %v2865_v39 }
 0x57e   : > { %5310 = vmatpush3.bf16.msra.mxu1 %v6357_v7  ;;  %5044 = vmatprep.mubr.msk.f32.mxu1 %vm2959_vm3, %v4558_v37 }
 0x57f   : > { %5312 = vmatprep.subr.bf16.mxu1 %v6366_v10 }
 0x582   : > { %5314 = vmatpush3.bf16.msra.mxu1 %v6366_v10 }
 0x583   : > { %5324 = vmatprep.subr.bf16.mxu1 %v6035_v1 }
 0x584   : > { %v5035_v45 = vpop.f32.mrb[30].mxu0 }
 0x585   : > { %5045 = vmatmul.mubr.msk.f32.vlgmr.msra.gmra.mrb[30].mxu1 %vm2959_vm3, %v4559_v43  ;;  %v3032_v41 = vpop.f32.mrb[31].mxu0 }
 0x586   : > { %5326 = vmatpush3.bf16.msra.mxu1 %v6035_v1 }
 0x587   : > { %5328 = vmatprep.subr.bf16.mxu1 %v6018_v61 }
 0x58c   : > { %v5057_v46 = vpop.f32.mrb[32].mxu0 }
 0x58d   : > { %v3200_v47 = vpop.f32.mrb[33].mxu0 }
 0x58e   : > { %5062 = vmatprep.mubr.msk.f32.mxu1 %vm700_vm1, %v3200_v47 }
 0x58f   : > { %5063 = vmatmul.mubr.msk.f32.vlgmr.msra.gmra.mrb[32].mxu1 %vm700_vm1, %v5057_v46 }
 0x590   : > { %5330 = vmatpush3.bf16.msra.mxu1 %v6018_v61  ;;  %5069 = vmatprep.mubr.msk.f32.mxu1 %vm700_vm1, %v3032_v41 }
 0x591   : > { %5340 = vmatprep.subr.bf16.mxu1 %v6109_v35 }
 0x594   : > { %v5082_v1 = vpop.f32.mrb[34].mxu0 }
 0x595   : > { %v3446_v48 = vpop.f32.mrb[35].mxu0 }
 0x597   : > { %5070 = vmatmul.mubr.msk.f32.vlgmr.msra.gmra.mrb[32].mxu1 %vm700_vm1, %v5035_v45 }
 0x598   : > { %5342 = vmatpush3.bf16.msra.mxu1 %v6109_v35  ;;  %5087 = vmatprep.mubr.msk.f32.mxu1 %vm700_vm1, %v3446_v48  ;;  %v4591_v35 = vld [vmem:[%s6668_s3 + $0x68] sm:$0xff] }
 0x599   : > { %5344 = vmatprep.subr.bf16.mxu1 %v6092_v30  ;;  %5142 = vmatmul.mubr.msk.f32.vlgmr.msra.gmra.mrb[38].mxu0 %vm2959_vm3, %v4591_v35 }
 0x59c   : > { %v5107_v61 = vpop.f32.mrb[36].mxu0 }
 0x59d   : > { %v3692_v49 = vpop.f32.mrb[37].mxu0 }
 0x59f   : > { %5088 = vmatmul.mubr.msk.f32.vlgmr.msra.gmra.mrb[32].mxu1 %vm700_vm1, %v5082_v1 }
 0x5a0   : > { %5346 = vmatpush3.bf16.msra.mxu1 %v6092_v30 }
 0x5a1   : > { %5356 = vmatprep.subr.bf16.mxu1 %v6167_v26 }
 0x648   : > { %v2637_v30 = vpop.f32.mrb[24].mxu1 }
 0x649   : > { %v2641_v53 = vadd.f32 %v2637_v30, %v6327_v36  ;;  %v4996_v57 = vpop.f32.mrb[25].mxu1  ;;  %v4584_v36 = vld [vmem:[%s6668_s3 + $0x50] sm:$0xff] }
 0x64a   : > { %v6540_v57 = vshrl.u32 %v4143_v55, 7 }
 0x64c   : > { %v2789_v59 = vpop.f32.mrb[26].mxu1 }
 0x64d   : > { %v2793_v60 = vadd.f32 %v2789_v59, %v6434_v24  ;;  %v5010_v62 = vpop.f32.mrb[27].mxu1 }
 0x64e   : > { %v4172_v62 = vsub.s32 2, %v6540_v57 }
 0x650   : > { %v2941_v63 = vpop.f32.mrb[28].mxu1 }
 0x651   : > { %v2945_v0 = vadd.f32 %v2941_v63, %v2641_v53  ;;  %v5024_v4 = vpop.f32.mrb[29].mxu1  ;;  %v4157_v63 = vsub.s32 1, %v6540_v57 }
 0x653   : > { %v2946_v3 = vadd.f32 %v2945_v0, %v2793_v60 }
 0x655   : > { %v2948_v5 = vadd.f32 %v2947_v2, %v2946_v3 }
 0x657   : > { %v4554_v6 = vmul.f32 -1.442695, %v2948_v5 }
 0x658   : > { %v5046_v8 = vpop.f32.mrb[30].mxu1 }
 0x659   : > { %5523 = vpow2.f32 %v4554_v6  ;;  %v3116_v9 = vpop.f32.mrb[31].mxu1  ;;  %v4187_v6 = vsub.s32 3, %v6540_v57 }
 0x65a   : > { %5094 = vmatprep.mubr.msk.f32.mxu1 %vm700_vm1, %v3116_v9 }
 0x65b   : > { %5095 = vmatmul.mubr.msk.f32.vlgmr.msra.gmra.mrb[32].mxu1 %vm700_vm1, %v5046_v8 }
 0x65c   : > { %5358 = vmatpush3.bf16.msra.mxu1 %v6167_v26  ;;  %5112 = vmatprep.mubr.msk.f32.mxu1 %vm700_vm1, %v3692_v49  ;;  %v4585_v26 = vld [vmem:[%s6668_s3 + $0x58] sm:$0xff] }
 0x65d   : > { %5360 = vmatprep.subr.bf16.mxu1 %v6357_v7 }
 0x663   : > { %v5524_v50 = vpop.eup %5523  ;;  %5113 = vmatmul.mubr.msk.f32.vlgmr.msra.gmra.mrb[32].mxu1 %vm700_vm1, %v5107_v61 }
 0x664   : > { %v2952_v19 = vadd.f32 1.0, %v5524_v50  ;;  %5362 = vmatpush3.bf16.msra.mxu1 %v6357_v7  ;;  %5123 = vmatprep.mubr.msk.f32.mxu1 %vm2959_vm3, %v4584_v36 }
 0x665   : > { %5364 = vmatprep.subr.bf16.mxu1 %v6366_v10 }
 0x666   : > { %5525 = vrcp.f32 %v2952_v19 }
 0x667   : > { %5527 = vpow2.f32 %v4520_v34 }
 0x668   : > { %5366 = vmatpush3.bf16.msra.mxu1 %v6366_v10  ;;  %v5635_v10 = vmov 3  }
 0x669   : > { %5368 = vmatprep.subr.bf16.mxu1 %v6208_v52 }
 0x66b   : > { %5124 = vmatmul.mubr.msk.f32.vlgmr.msra.gmra.mrb[34].mxu1 %vm2959_vm3, %v4585_v26 }
 0x66c   : > { %5370 = vmatpush3.bf16.msra.mxu1 %v6208_v52  ;;  %v5638_v52 = vmov 9   ;;  %v5143_v20 = vpop.f32.mrb[38].mxu0 }
 0x66d   : > { %5380 = vmatprep.subr.bf16.mxu1 %v6220_v58  ;;  %v4026_v23 = vpop.f32.mrb[39].mxu0 }
 0x670   : > { %v5526_v7 = vpop.eup %5525 }
 0x671   : > { %v6507_v11 = vmul.f32 0.33333334, %v5526_v7  ;;  %v5528_v1 = vpop.eup %5527  ;;  %v4202_v7 = vsub.s32 4, %v6540_v57 }
 0x672   : > { %v1883_v48 = vadd.f32 1.0, %v5528_v1 }
 0x673   : > { %4151 = vperm.xlu1 %5507, %v6507_v11   ;;  %4139 = vperm.xlu0 %5506, %v6507_v11  }
 0x677   : > { %5509 = vset.pattern.permute.xlu1 %v5635_v10  ;;  %5508 = vset.pattern.permute.xlu0 %v5636_v12  ;;  %v4145_v10 = vsub.s32 0, %v6540_v57 }
 0x678   : > { %4181 = vperm.xlu1 %5509, %v6507_v11   ;;  %4166 = vperm.xlu0 %5508, %v6507_v11  }
 0x67c   : > { %5510 = vset.pattern.permute.xlu1 %v5637_v42  ;;  %5515 = vset.pattern.permute.xlu0 %v5638_v52 }
 0x67d   : > { %4196 = vperm.xlu1 %5510, %v6507_v11   ;;  %4281 = vperm.xlu0 %5515, %v6507_v11  }
 0x681   : > { %5511 = vset.pattern.permute.xlu1 %v5639_v14  ;;  %5522 = vset.pattern.permute.xlu0 %v5648_v27 }
 0x682   : > { %4211 = vperm.xlu1 %5511, %v6507_v11  }
 0x686   : > { %5512 = vset.pattern.permute.xlu1 %v5640_v44 }
 0x687   : > { %4226 = vperm.xlu1 %5512, %v6507_v11  }
 0x68b   : > { %5513 = vset.pattern.permute.xlu1 %v5641_v15 }
 0x68c   : > { %4241 = vperm.xlu1 %5513, %v6507_v11  }
 0x690   : > { %5514 = vset.pattern.permute.xlu1 %v5642_v16 }
 0x691   : > { %4269 = vperm.xlu1 %5514, %v6507_v11  }
 0x695   : > { %5516 = vset.pattern.permute.xlu1 %v5643_v18  ;;  %v4247_v18 = vsub.s32 7, %v6540_v57 }
 0x696   : > { %4296 = vperm.xlu1 %5516, %v6507_v11  }
 0x69a   : > { %5517 = vset.pattern.permute.xlu1 %v5644_v56 }
 0x69b   : > { %4311 = vperm.xlu1 %5517, %v6507_v11  }
 0x69f   : > { %5518 = vset.pattern.permute.xlu1 %v5645_v21  ;;  %v4217_v21 = vsub.s32 5, %v6540_v57 }
 0x6a0   : > { %4326 = vperm.xlu1 %5518, %v6507_v11  }
 0x6a4   : > { %5519 = vset.pattern.permute.xlu1 %v5646_v22 }
 0x6a5   : > { %4341 = vperm.xlu1 %5519, %v6507_v11  }
 0x6a9   : > { %5520 = vset.pattern.permute.xlu1 %v5647_v17 }
 0x6aa   : > { %4356 = vperm.xlu1 %5520, %v6507_v11  }
 0x6ae   : > { %5521 = vset.pattern.permute.xlu1 %v5648_v27 }
 0x6f2   : > { %v4152_v28 = vpop.permute.xlu1 %4151  ;;  %v4140_v51 = vpop.permute.xlu0 %4139 }
 0x6f7   : > { %v6529_v29 = vpop.permute.xlu1 %4181  ;;  %v4167_v53 = vpop.permute.xlu0 %4166 }
 0x6fc   : > { %v6531_v32 = vpop.permute.xlu1 %4196  ;;  %v4282_v4 = vpop.permute.xlu0 %4281 }
 0x701   : > { %v6534_v38 = vpop.permute.xlu1 %4211 }
 0x706   : > { %v6536_v43 = vpop.permute.xlu1 %4226 }
 0x70b   : > { %v6538_v47 = vpop.permute.xlu1 %4241 }
 0x710   : > { %v4270_v13 = vpop.permute.xlu1 %4269 }
 0x715   : > { %v4297_v30 = vpop.permute.xlu1 %4296 }
 0x71a   : > { %v4312_v60 = vpop.permute.xlu1 %4311 }
 0x71f   : > { %v4327_v26 = vpop.permute.xlu1 %4326 }
 0x724   : > { %v4342_v27 = vpop.permute.xlu1 %4341 }
 0x73e   : > { %v5125_v24 = vpop.f32.mrb[34].mxu1 }
 0x73f   : > { %v3859_v25 = vpop.f32.mrb[35].mxu1 }
 0x740   : > { %5130 = vmatprep.mubr.msk.f32.mxu1 %vm700_vm1, %v3859_v25 }
 0x741   : > { %5131 = vmatmul.mubr.msk.f32.vlgmr.msra.gmra.mrb[32].mxu1 %vm700_vm1, %v5125_v24 }
 0x742   : > { %5382 = vmatpush3.bf16.msra.mxu1 %v6220_v58  ;;  %5148 = vmatprep.mubr.msk.f32.mxu1 %vm700_vm1, %v4026_v23  ;;  %v4120_v58 = vstv %s4555_s23 }
 0x749   : > { %5149 = vmatmul.mubr.msk.f32.vlgmr.msra.gmra.mrb[32].mxu1 %vm700_vm1, %v5143_v20 }
 0x81c   : > { %v5150_v37 = vpop.f32.mrb[32].mxu1 }
 0x81d   : > { %v4122_v39 = vadd.f32 %v5150_v37, %v4120_v58  ;;  %v4107_v40 = vpop.f32.mrb[33].mxu1 }
 0x81e   : > { %v4121_v45 = vadd.f32 %v4120_v58, %v4107_v40 }
 0x81f   : > { %v4597_v41 = vmul.f32 -1.442695, %v4122_v39 }
 0x820   : > { %v4596_v46 = vmul.f32 -1.442695, %v4121_v45  ;;  %v4232_v45 = vsub.s32 6, %v6540_v57 }
 0x821   : > { %5529 = vpow2.f32 %v4597_v41 }
 0x822   : > { %5531 = vpow2.f32 %v4596_v46  ;;  %v4357_v46 = vpop.permute.xlu1 %4356 }
 0x823   : > { %5533 = vrcp.f32 %v1883_v48 }
 0x82b   : > { %v5530_v61 = vpop.eup %5529 }
 0x82c   : > { %v5532_v49 = vpop.eup %5531  ;;  %v4130_v35 = vadd.f32 1.0, %v5530_v61 }
 0x82d   : > { %v4129_v54 = vadd.f32 1.0, %v5532_v49  ;;  %v5534_v59 = vpop.eup %5533 }
 0x82e   : > { %5535 = vrcp.f32 %v4130_v35  ;;  %v6544_v3 = vmul.f32 0.33333334, %v5534_v59 }
 0x82f   : > { %5537 = vrcp.f32 %v4129_v54 }
 0x830   : > { %v4284_v9 = vadd.f32 %v4282_v4, %v6544_v3  ;;  %v4299_v36 = vadd.f32 %v4297_v30, %v6544_v3  ;;  %v4154_v44 = vadd.f32 %v4152_v28, %v6544_v3  ;;  %v4142_v15 = vadd.f32 %v4140_v51, %v6544_v3 }
 0x831   : > { %v4314_v16 = vadd.f32 %v4312_v60, %v6544_v3  ;;  %v4272_v56 = vadd.f32 %v4270_v13, %v6544_v3  ;;  %v4169_v33 = vadd.f32 %v4167_v53, %v6544_v3  ;;  %v4329_v34 = vadd.f32 %v4327_v26, %v6544_v3 }
 0x832   : > { %v4344_v41 = vadd.f32 %v4342_v27, %v6544_v3  ;;  %v4359_v13 = vadd.f32 %v4357_v46, %v6544_v3  ;;  %v4184_v51 = vadd.f32 %v6529_v29, %v6544_v3  ;;  %v4199_v55 = vadd.f32 %v6531_v32, %v6544_v3 }
 0x833   : > { %v4214_v53 = vadd.f32 %v6534_v38, %v6544_v3  ;;  %v4229_v59 = vadd.f32 %v6536_v43, %v6544_v3  ;;  %v4278_v38 = vld [vmem:[%s5801_s28 + $0x8] sm:$0xff] }
 0x838   : > { %v5536_v0 = vpop.eup %5535 }
 0x839   : > { %v5538_v2 = vpop.eup %5537  ;;  %v4136_v5 = vmul.f32 0.33333334, %v5536_v0 }
 0x83a   : > { %v6547_v8 = vmul.f32 0.33333334, %v5538_v2 }
 0x83b   : > { %v4303_v50 = vrot.slane %v4136_v5, %v4172_v62  ;;  %v4288_v19 = vrot.slane %v4136_v5, %v4157_v63  ;;  %v4318_v52 = vrot.slane %v4136_v5, %v4187_v6  ;;  %v4276_v22 = vrot.slane %v4136_v5, %v4145_v10 }
 0x83c   : > { %v4158_v14 = vrot.slane %v6547_v8, %v4157_v63  ;;  %v4146_v17 = vrot.slane %v6547_v8, %v4145_v10  ;;  %v4333_v24 = vrot.slane %v4136_v5, %v4202_v7  ;;  %v4173_v25 = vrot.slane %v6547_v8, %v4172_v62 }
 0x83d   : > { %v4304_v12 = vadd.f32 %v4303_v50, %v4299_v36  ;;  %v4289_v42 = vadd.f32 %v4288_v19, %v4284_v9  ;;  %v4319_v20 = vadd.f32 %v4318_v52, %v4314_v16  ;;  %v4277_v28 = vadd.f32 %v4276_v22, %v4272_v56  ;;  %v4148_v22 = vld [vmem:[%s5801_s28] sm:$0xff] }
 0x83e   : > { %v4159_v23 = vadd.f32 %v4158_v14, %v4154_v44  ;;  %v6564_v31 = vadd.f32 %v4146_v17, %v4142_v15  ;;  %v6570_v58 = vrot.slane %v4136_v5, %v4247_v18  ;;  %v4334_v37 = vadd.f32 %v4333_v24, %v4329_v34 }
 0x83f   : > { %4306 = vrot.lane.b32.xlu0 %v4304_v12, %s6694_s17  ;;  %4291 = vrot.lane.b32.xlu1 %v4289_v42, %s6698_s21  ;;  %v4174_v39 = vadd.f32 %v4173_v25, %v4169_v33  ;;  %v4348_v40 = vrot.slane %v4136_v5, %v4217_v21  ;;  %v4363_v48 = vrot.slane %v4136_v5, %v4232_v45 }
 0x840   : > { %v4188_v49 = vrot.slane %v6547_v8, %v4187_v6  ;;  %v4203_v54 = vrot.slane %v6547_v8, %v4202_v7  ;;  %v4233_v57 = vrot.slane %v6547_v8, %v4232_v45  ;;  %v4248_v60 = vrot.slane %v6547_v8, %v4247_v18 }
 0x841   : > { %v4349_v1 = vadd.f32 %v4348_v40, %v4344_v41  ;;  %v4364_v61 = vadd.f32 %v4363_v48, %v4359_v13  ;;  %v4244_v62 = vadd.f32 %v6538_v47, %v6544_v3  ;;  %v4279_v5 = vmul.f32 %v4278_v38, %v4277_v28 }
 0x842   : > { %v4189_v35 = vadd.f32 %v4188_v49, %v4184_v51  ;;  %v4204_v30 = vadd.f32 %v4203_v54, %v4199_v55  ;;  %v4234_v32 = vadd.f32 %v4233_v57, %v4229_v59  ;;  %v4149_v25 = vmul.f32 %v4148_v22, %v6564_v31 }
 0x843   : > { %4321 = vrot.lane.b32.xlu0 %v4319_v20, %s6699_s0  ;;  %4161 = vrot.lane.b32.xlu1 %v4159_v23, %s6698_s21  ;;  %v4249_v63 = vadd.f32 %v4248_v60, %v4244_v62 }
 0x847   : > { %4336 = vrot.lane.b32.xlu0 %v4334_v37, %s6696_s29  ;;  %4176 = vrot.lane.b32.xlu1 %v4174_v39, %s6694_s17  ;;  %s6700_s17 = smov 112  }
 0x84b   : > { %4351 = vrot.lane.b32.xlu0 %v4349_v1, %s6697_s24  ;;  %4371 = vperm.xlu1 %5521, %v6507_v11   ;;  %v4218_v11 = vrot.slane %v6547_v8, %v4217_v21 }
 0x84d   : > { %v4219_v29 = vadd.f32 %v4218_v11, %v4214_v53 }
 0x84f   : > { %4366 = vrot.lane.b32.xlu0 %v4364_v61, %s6695_s26 }
 0x853   : > { %4191 = vrot.lane.b32.xlu0 %v4189_v35, %s6699_s0 }
 0x857   : > { %4206 = vrot.lane.b32.xlu0 %v4204_v30, %s6696_s29 }
 0x85b   : > { %4221 = vrot.lane.b32.xlu0 %v4219_v29, %s6697_s24  ;;  %s4604_s24 = sshll.u32 %s5721_s13, 8  ;;  %s5649_s13 = smov [#allocation5]  }
 0x85c   : > { %s6623_s16 = scalar_lea.hbm %s6674_s9, %s4604_s24  ;;  %s5558_s21 = sshll.u32 %s5649_s13, 4  ;;  %s5559_s21 = int_to_ptr.vmem [resolvable:$false] %s5558_s21 }
 0x85d   : > { %s5560_s0 = scalar_lea.vmem %s5559_s21, 512 }
 0x85f   : > { %4236 = vrot.lane.b32.xlu0 %v4234_v32, %s6695_s26  ;;  %s337_s26 = sand.u32 1, %s5612_s10  }
 0x860   : > { %s4485_s28 = sshll.u32 %s337_s26, 4  ;;  %s4394_s27 = scalar_lea.sflag [#allocation3], %s337_s26 }
 0x861   : > { %s339_s29 = scalar_lea.vmem [#allocation5], %s4485_s28 }
 0x862   : > { %s4408_s22 = sshll.u32 %s339_s29, 4  ;;  %s6625_s22 = int_to_ptr.vmem [resolvable:$true] %s4408_s22 }
 0x863   : > { %4251 = vrot.lane.b32.xlu0 %v4249_v63, %s6700_s17  ;;  %s5554_s23 = scalar_lea.vmem %s6625_s22, 256  ;;  %p5561_p13 = scmp.lt.s32.totalorder %s6625_s22, %s5559_s21 }
 0x864   : > { %p5555_p9 = scmp.ne.s32.totalorder %s6625_s22, %s5554_s23  ;;  %p5562_p0 = scmp.lt.s32.totalorder %s5560_s0, %s5554_s23 }
 0x866   : > { %p5556_p10 = pnand %p5555_p9, %p5738_p5  ;;  %p5563_p1 = por %p5562_p0, %p5561_p13 }
 0x868   : > { %p5557_p12 = pneg %p5556_p10 }
 0x86a   : > { %p5564_p2 = pnand %p5563_p1, %p5557_p12 }
 0x8b1   : > { %v4307_v0 = vpop.permute.xlu0 %4306  ;;  %v4292_v4 = vpop.permute.xlu1 %4291 }
 0x8b2   : > { %v4309_v2 = vmul.f32 %v4307_v0, %v4278_v38  ;;  %v4294_v6 = vmul.f32 %v4292_v4, %v4278_v38 }
 0x8b4   : > { %v4385_v43 = vsel %vm700_vm1, %v4279_v5, %v4294_v6 }
 0x8b5   : > { %v4322_v9 = vpop.permute.xlu0 %4321  ;;  %v4386_v8 = vsel %vm2959_vm3, %v4385_v43, %v4309_v2  ;;  %v4162_v12 = vpop.permute.xlu1 %4161 }
 0x8b6   : > { %v4324_v36 = vmul.f32 %v4322_v9, %v4278_v38  ;;  %v4164_v23 = vmul.f32 %v4162_v12, %v4148_v22 }
 0x8b8   : > { %v4387_v47 = vsel %vm4257_vm0, %v4386_v8, %v4324_v36  ;;  %v4255_v34 = vsel %vm700_vm1, %v4149_v25, %v4164_v23 }
 0x8b9   : > { %v4337_v50 = vpop.permute.xlu0 %4336  ;;  %v4177_v16 = vpop.permute.xlu1 %4176 }
 0x8ba   : > { %v4339_v19 = vmul.f32 %v4337_v50, %v4278_v38  ;;  %v4179_v24 = vmul.f32 %v4177_v16, %v4148_v22 }
 0x8bc   : > { %v4388_v26 = vsel %vm4259_vm4, %v4387_v47, %v4339_v19 }
 0x8bd   : > { %v4352_v7 = vpop.permute.xlu0 %4351 }
 0x8be   : > { %v4354_v10 = vmul.f32 %v4352_v7, %v4278_v38 }
 0x8c0   : > { %v4389_v42 = vsel %vm4261_vm5, %v4388_v26, %v4354_v10 }
 0x8c1   : > { %v4367_v52 = vpop.permute.xlu0 %4366 }
 0x8c2   : > { %v4369_v14 = vmul.f32 %v4367_v52, %v4278_v38 }
 0x8c4   : > { %v4390_v44 = vsel %vm4263_vm6, %v4389_v42, %v4369_v14 }
 0x8c5   : > { %v4192_v15 = vpop.permute.xlu0 %4191 }
 0x8c6   : > { %v4194_v27 = vmul.f32 %v4192_v15, %v4148_v22 }
 0x8c9   : > { %v4207_v18 = vpop.permute.xlu0 %4206 }
 0x8ca   : > { %v4372_v56 = vpop.permute.xlu1 %4371  ;;  %v4209_v28 = vmul.f32 %v4207_v18, %v4148_v22 }
 0x8cb   : > { %v4374_v21 = vadd.f32 %v4372_v56, %v6544_v3  ;;  %v4256_v3 = vsel %vm2959_vm3, %v4255_v34, %v4179_v24 }
 0x8cd   : > { %v4379_v17 = vadd.f32 %v6570_v58, %v4374_v21  ;;  %v4222_v20 = vpop.permute.xlu0 %4221  ;;  %v4258_v58 = vsel %vm4257_vm0, %v4256_v3, %v4194_v27 }
 0x8ce   : > { %v4224_v37 = vmul.f32 %v4222_v20, %v4148_v22  ;;  %v4260_v40 = vsel %vm4259_vm4, %v4258_v58, %v4209_v28 }
 0x8cf   : > { %4381 = vrot.lane.b32.xlu0 %v4379_v17, %s6700_s17 }
 0x8d0   : > { %v4262_v31 = vsel %vm4261_vm5, %v4260_v40, %v4224_v37 }
 0x8d1   : > { %v4237_v33 = vpop.permute.xlu0 %4236 }
 0x8d2   : > { %v4239_v39 = vmul.f32 %v4237_v33, %v4148_v22 }
 0x8d4   : > { %v4264_v46 = vsel %vm4263_vm6, %v4262_v31, %v4239_v39 }
 0x8d5   : > { %v4252_v45 = vpop.permute.xlu0 %4251 }
 0x8d6   : > { %v4254_v41 = vmul.f32 %v4252_v45, %v4148_v22 }
 0x8d8   : > { %v4266_v1 = vsel %vm4265_vm7, %v4264_v46, %v4254_v41 }
 0x8d9   : > { %4267 = vst [vmem:[%s339_s29] sm:$0xff] %v4266_v1 }
 0x941   : > { %v4382_v48 = vpop.permute.xlu0 %4381 }
 0x942   : > { %v4384_v13 = vmul.f32 %v4382_v48, %v4278_v38 }
 0x944   : > { %v4391_v61 = vsel %vm4265_vm7, %v4390_v44, %v4384_v13 }
 0x945   : > { %4392 = vst [vmem:[%s339_s29 + $0x8] sm:$0xff] %v4391_v61 }
 0x946   : > { %5567 = shalt.err (!%p5564_p2)
}
 0x947   : > { %s5568_s17 = scalar_lea.hbm %s6623_s16, 256  ;;  %s5572_s29 = scalar_lea.hbm %s6674_s9, 512 }
 0x948   : > { %p5569_p3 = scmp.ne.s32.totalorder %s6623_s16, %s5568_s17  ;;  %p5573_p8 = scmp.lt.u32.totalorder %s6623_s16, %s6674_s9 }
 0x949   : > { %p5574_p11 = scmp.lt.u32.totalorder %s5572_s29, %s5568_s17  ;;  %p5576_p10 = scmp.lt.u32.totalorder %s5568_s17, %s6623_s16 }
 0x94a   : > { %p5570_p4 = pnand %p5569_p3, %p5738_p5 }
 0x94b   : > { %p5575_p9 = por %p5574_p11, %p5573_p8 }
 0x94c   : > { %p5571_p7 = pneg %p5570_p4 }
 0x94d   : > { %p5577_p12 = por %p5576_p10, %p5575_p9 }
 0x94f   : > { %p5578_p13 = pnand %p5577_p12, %p5571_p7 }
 0x951   : > { %5581 = shalt.err (!%p5578_p13)
}
 0x952   : > { %5399 = dma.vmem_to_hbm [thread:$0]  (%p5738_p5), %s6625_s22, 256, %s6623_s16, %s4394_s27  }
 0x953 PF: > { %p5411_p0 = scmp.ge.s32.totalorder %s5620_s12, 2  ;;  %s4420_s14 = sand.u32 1, %s5608_s30  }
 0x954   : > { %s4421_s23 = scalar_lea.sflag [#allocation3], %s4420_s14 }
 0x955   : > { %p5406_p1 = pnand %p5411_p0, %p5742_p6 }
 0x957   : > { %5603 = dma.done.wait (!%p5406_p1), %s4421_s23, 256  }
 0x958   : > { %5605 = vsyncadd (!%p5406_p1), %s4421_s23, 4294967040  ;;  %p20_p2 = scmp.ge.s32.totalorder %s5725_s15, 4   ;;  %s6701_s30 = smov %s5612_s10 }
 0x959   : > { %s6702_s10 = smov %s5616_s11  ;;  %s6703_s11 = smov %s5736_s18 }
 0x95a   : > { %s6704_s12 = smov %s5725_s15  ;;  %22 = sbr.rel (!%p20_p2) target bundleno = 6 (0x6), region = 126 }
 0x961   :  { %4426 = vsyncpa [#allocation3], 1 }
 0x962   :  { %4428 = vsyncpa [#allocation3 + $0x1], 1 }
 0x963   :  { %4429 = vsyncpa [#allocation4], 1 }
 0x964   :  { %4431 = vsyncpa [#allocation4 + $0x1], 1 }

</bundles_post_ra>
